<compile_context>
chip_gen: v5e
topology: v5e:2x2
jax: 0.10.0
libtpu: 0.0.40
codegen_flags: <defaults>
</compile_context>

<pallas_src>
import functools
import math

import numpy as np

import jax
import jax.numpy as jnp
from jax.experimental import pallas as pl
from jax.experimental.pallas import tpu as pltpu


def _round_up(x, m):
    return (x + m - 1) // m * m


@functools.lru_cache(maxsize=None)
def _vmem_limit_bytes():
    """Per-generation VMEM budget (v5e/v6e: 128 MiB, v7x: 64 MiB)."""
    cap = 64 * 1024 * 1024  # conservative fallback (v7x-sized)
    try:
        info = pltpu.get_tpu_info()
        cap = int(getattr(info, "vmem_capacity_bytes", cap)) or cap
    except Exception:
        pass
    return max(32 * 1024 * 1024, min(cap * 3 // 4, 96 * 1024 * 1024))


# ---------------------------------------------------------------------------
# Kernel 1: fused (im2col matmul on MXU) -> folded BatchNorm -> Swish
#   bf16 operands, f32 accumulate / epilogue, bf16 (or f32) stores.
# ---------------------------------------------------------------------------
def _matmul_bn_act_kernel_noacc(x_ref, w_ref, s_ref, b_ref, o_ref):
    y = jnp.dot(x_ref[...], w_ref[...], preferred_element_type=jnp.float32)
    y = y * s_ref[...] + b_ref[...]
    o_ref[...] = (y * jax.nn.sigmoid(y)).astype(o_ref.dtype)


def _matmul_bn_act_kernel_acc(x_ref, w_ref, s_ref, b_ref, o_ref, acc_ref, *, nk):
    kk = pl.program_id(2)

    @pl.when(kk == 0)
    def _():
        acc_ref[...] = jnp.zeros_like(acc_ref)

    acc_ref[...] += jnp.dot(x_ref[...], w_ref[...],
                            preferred_element_type=jnp.float32)

    @pl.when(kk == nk - 1)
    def _():
        y = acc_ref[...] * s_ref[...] + b_ref[...]
        o_ref[...] = (y * jax.nn.sigmoid(y)).astype(o_ref.dtype)


@functools.lru_cache(maxsize=None)
def _get_matmul_fn(Mp, Kp, Np, tm, tk, tn, out_dtype):
    nm, nn, nk = Mp // tm, Np // tn, Kp // tk
    vmem = _vmem_limit_bytes()
    # TODO(synk): pipeline_mode=pl.Buffered(1) on the constant-index weight /
    #             scale / bias blocks would drop their second VMEM buffer;
    #             skipped here and instead accounted for in _pick_tiles.
    if nk == 1:
        return pl.pallas_call(
            _matmul_bn_act_kernel_noacc,
            out_shape=jax.ShapeDtypeStruct((Mp, Np), out_dtype),
            grid=(nm, nn),
            in_specs=[
                pl.BlockSpec((tm, Kp), lambda i, j: (i, 0)),   # activations
                pl.BlockSpec((Kp, tn), lambda i, j: (0, j)),   # weights
                pl.BlockSpec((1, tn), lambda i, j: (0, j)),    # BN scale
                pl.BlockSpec((1, tn), lambda i, j: (0, j)),    # BN bias
            ],
            out_specs=pl.BlockSpec((tm, tn), lambda i, j: (i, j)),
            compiler_params=pltpu.CompilerParams(
                dimension_semantics=("parallel", "parallel"),
                vmem_limit_bytes=vmem),
        )
    return pl.pallas_call(
        functools.partial(_matmul_bn_act_kernel_acc, nk=nk),
        out_shape=jax.ShapeDtypeStruct((Mp, Np), out_dtype),
        grid=(nm, nn, nk),
        in_specs=[
            pl.BlockSpec((tm, tk), lambda i, j, kk: (i, kk)),
            pl.BlockSpec((tk, tn), lambda i, j, kk: (kk, j)),
            pl.BlockSpec((1, tn), lambda i, j, kk: (0, j)),
            pl.BlockSpec((1, tn), lambda i, j, kk: (0, j)),
        ],
        out_specs=pl.BlockSpec((tm, tn), lambda i, j, kk: (i, j)),
        scratch_shapes=[pltpu.VMEM((tm, tn), jnp.float32)],
        compiler_params=pltpu.CompilerParams(
            dimension_semantics=("parallel", "parallel", "arbitrary"),
            vmem_limit_bytes=vmem),
    )


def _pick_tiles(M, Kp, Np, out_bytes):
    """Choose (tm, tk, tn) with a bounded per-step VMEM working set."""
    limit = _vmem_limit_bytes()
    budget = int(limit * 0.85)

    def largest_div(total, cands):
        for c in cands:
            if c <= total and total % c == 0:
                return c
        return total

    tn = largest_div(Np, (512, 384, 256, 128))
    # Tile K only when the (double-buffered) weight block would hog VMEM.
    tk = Kp
    if Kp >= 512 and 2 * Kp * tn * 2 > budget // 3:
        tk = largest_div(Kp, (512, 256, 128))
    nk = Kp // tk

    def step_bytes(tm_, tk_, tn_):
        b = 2 * tm_ * tk_ * 2            # bf16 LHS block, double-buffered
        b += 2 * tk_ * tn_ * 2           # bf16 weight block, double-buffered
        b += 2 * tm_ * tn_ * out_bytes   # output block, double-buffered
        b += 4 * tn_ * 4                 # scale + bias
        if nk > 1:
            b += tm_ * tn_ * 4           # f32 accumulator scratch
        return b

    big_vmem = limit >= 80 * 1024 * 1024           # v5e / v6e class
    tm = 1024 if (big_vmem and 2 * tk * tn * 2 <= 4 * 1024 * 1024) else 512
    if M <= 2 * tm:                                # keep >= 2 grid steps along M
        tm = max(16, _round_up((M + 1) // 2, 16))
    while tn > 128 and step_bytes(tm, tk, tn) > budget:
        tn = largest_div(Np, tuple(c for c in (384, 256, 128) if c < tn))
    while tm > 16 and step_bytes(tm, tk, tn) > budget:
        tm = max(16, _round_up(tm // 2, 16))
    return tm, tk, tn


def _matmul_bn_act(x2d_bf16, w2d, scale, bias, out_dtype):
    M, K = x2d_bf16.shape
    _, Nout = w2d.shape
    # Lane-align the contraction dim when K is large; 16-sublane for tiny K.
    Kp = _round_up(K, 128) if K > 256 else _round_up(K, 16)
    Np = _round_up(Nout, 128)                       # lane-dense output stores
    out_bytes = np.dtype(out_dtype).itemsize
    tm, tk, tn = _pick_tiles(M, Kp, Np, out_bytes)
    Mp = _round_up(M, tm)                           # pad, never assert on M

    xp = jnp.pad(x2d_bf16, ((0, Mp - M), (0, Kp - K)))
    wp = jnp.pad(w2d.astype(jnp.bfloat16), ((0, Kp - K), (0, Np - Nout)))
    sp = jnp.pad(scale.astype(jnp.float32).reshape(1, Nout), ((0, 0), (0, Np - Nout)))
    bp = jnp.pad(bias.astype(jnp.float32).reshape(1, Nout), ((0, 0), (0, Np - Nout)))
    out = _get_matmul_fn(Mp, Kp, Np, tm, tk, tn, out_dtype)(xp, wp, sp, bp)
    return out[:M, :Nout]


# ---------------------------------------------------------------------------
# Kernel 2: depthwise conv (k*k shifted-window MAC on VPU) -> BN -> Swish
#   Stride handled via stride^2 phase planes (same bytes as the padded input),
#   so every tap is a static in-kernel window read -- no k^2 patch tensor.
# ---------------------------------------------------------------------------
def _dw_bn_swish_kernel(p_ref, w_ref, s_ref, b_ref, o_ref, *, k, stride, Hout, Wout):
    # TODO(synk): taps with c0 != 0 slice at a sublane-misaligned W offset; a
    #             pltpu.roll (XLU) pre-shift per phase could remove any
    #             relayout copies if the Mosaic dump shows them.
    planes = {}
    acc = None
    for kh in range(k):
        for kw in range(k):
            ph = (kh % stride) * stride + (kw % stride)
            if ph not in planes:
                # one bf16->f32 cast per phase plane (s^2), not per tap (k^2)
                planes[ph] = p_ref[ph].astype(jnp.float32)    # (Hps, Wps, tc)
            r0, c0 = kh // stride, kw // stride
            win = planes[ph][r0:r0 + Hout, c0:c0 + Wout, :]
            t = kh * k + kw
            term = win * w_ref[t:t + 1, :]                    # (Hout,Wout,tc)*(1,tc)
            acc = term if acc is None else acc + term
    y = acc * s_ref[...] + b_ref[...]
    o_ref[0] = (y * jax.nn.sigmoid(y)).astype(o_ref.dtype)


@functools.lru_cache(maxsize=None)
def _get_dw_fn(N, Hps, Wps, Cp, tc, k, stride, Hout, Wout, out_dtype):
    s2 = stride * stride
    k2 = k * k
    return pl.pallas_call(
        functools.partial(_dw_bn_swish_kernel, k=k, stride=stride,
                          Hout=Hout, Wout=Wout),
        out_shape=jax.ShapeDtypeStruct((N, Hout, Wout, Cp), out_dtype),
        grid=(N, Cp // tc),
        in_specs=[
            pl.BlockSpec((s2, Hps, Wps, tc), lambda n, c: (n, 0, 0, c)),
            pl.BlockSpec((k2, tc), lambda n, c: (0, c)),
            pl.BlockSpec((1, tc), lambda n, c: (0, c)),
            pl.BlockSpec((1, tc), lambda n, c: (0, c)),
        ],
        out_specs=pl.BlockSpec((1, Hout, Wout, tc), lambda n, c: (n, 0, 0, c)),
        compiler_params=pltpu.CompilerParams(
            dimension_semantics=("parallel", "parallel"),
            vmem_limit_bytes=_vmem_limit_bytes()),
    )


def _pick_dw_tc(C, s2, Hps, Wps, Hout, Wout, k, out_bytes):
    budget = int(_vmem_limit_bytes() * 0.7)
    Cp128 = _round_up(C, 128)

    def step_bytes(tc):
        b = 2 * s2 * Hps * Wps * tc * 2          # bf16 phase planes (dbl-buf)
        b += 2 * Hout * Wout * tc * out_bytes    # output tile (dbl-buf)
        b += s2 * Hps * Wps * tc * 4             # in-kernel f32 plane values
        b += Hout * Wout * tc * 4                # f32 accumulator value
        b += 2 * (k * k + 2) * tc * 4            # weights / scale / bias
        return b

    for cand in (512, 384, 256, 128):
        if cand <= Cp128 and step_bytes(cand) <= budget:
            return cand
    return 128


def _depthwise_bn_swish(x_nhwc_bf16, w_dw, scale, bias, k, stride, out_dtype):
    # TODO(synk): very large feature maps would additionally need an Hout
    #             row-tile grid axis with a (k-1)-row halo to fit v7x VMEM.
    N, H, W, C = x_nhwc_bf16.shape
    pad = (k - 1) // 2
    Hout = (H + 2 * pad - k) // stride + 1
    Wout = (W + 2 * pad - k) // stride + 1
    s2 = stride * stride
    Hpp = _round_up(H + 2 * pad, stride)
    Wpp = _round_up(W + 2 * pad, stride)
    Hps, Wps = Hpp // stride, Wpp // stride
    out_bytes = np.dtype(out_dtype).itemsize
    tc = _pick_dw_tc(C, s2, Hps, Wps, Hout, Wout, k, out_bytes)
    Cp = _round_up(C, tc)

    xp = jnp.pad(x_nhwc_bf16,
                 ((0, 0), (pad, Hpp - H - pad), (pad, Wpp - W - pad), (0, Cp - C)))
    # (N,Hps,s,Wps,s,Cp) -> (N,s,s,Hps,Wps,Cp) -> (N*s2, Hps, Wps, Cp)
    phases = xp.reshape(N, Hps, stride, Wps, stride, Cp)
    phases = jnp.transpose(phases, (0, 2, 4, 1, 3, 5)).reshape(N * s2, Hps, Wps, Cp)

    w2 = jnp.pad(w_dw.astype(jnp.float32), ((0, 0), (0, Cp - C)))
    sp = jnp.pad(scale.astype(jnp.float32).reshape(1, C), ((0, 0), (0, Cp - C)))
    bp = jnp.pad(bias.astype(jnp.float32).reshape(1, C), ((0, 0), (0, Cp - C)))
    out = _get_dw_fn(N, Hps, Wps, Cp, tc, k, stride, Hout, Wout, out_dtype)(
        phases, w2, sp, bp)
    return out[..., :C]


# ---------------------------------------------------------------------------
# ConvBnAct forward.  NHWC entry point (no per-layer transposes) plus an
# NCHW wrapper matching the PyTorch module's interface.
# ---------------------------------------------------------------------------
def _conv_via_matmul(x_nhwc_bf16, w2d, scale, bias, k, stride, out_dtype):
    N, H, W, Cin = x_nhwc_bf16.shape
    pad = (k - 1) // 2
    Hout = (H + 2 * pad - k) // stride + 1
    Wout = (W + 2 * pad - k) // stride + 1
    if k == 1 and stride == 1:
        col = x_nhwc_bf16.reshape(N * H * W, Cin)
    else:
        xp = jnp.pad(x_nhwc_bf16, ((0, 0), (pad, pad), (pad, pad), (0, 0)))
        cols = []
        for kh in range(k):
            for kw in range(k):
                cols.append(xp[:, kh:kh + (Hout - 1) * stride + 1:stride,
                                  kw:kw + (Wout - 1) * stride + 1:stride, :])
        # built in bf16: half the HBM traffic of an f32 im2col intermediate
        col = jnp.concatenate(cols, axis=-1).reshape(N * Hout * Wout, k * k * Cin)
    out = _matmul_bn_act(col, w2d, scale, bias, out_dtype)
    return out.reshape(N, Hout, Wout, -1)


@functools.partial(jax.jit, static_argnames=("kernel_size", "stride", "groups",
                                             "eps", "out_dtype"))
def conv_bn_act_nhwc(x_nhwc, weight, gamma, beta, running_mean, running_var, *,
                     kernel_size, stride, groups, eps=1e-3,
                     out_dtype=jnp.bfloat16):
    """NHWC-in / NHWC-out Swish(BatchNorm2d(Conv2d(x, bias=False))) (eval BN).

    Chain layers in NHWC/bf16 and only transpose at the model boundary."""
    k = kernel_size
    scale = gamma.astype(jnp.float32) / jnp.sqrt(running_var.astype(jnp.float32) + eps)
    bias = beta.astype(jnp.float32) - running_mean.astype(jnp.float32) * scale
    x = x_nhwc.astype(jnp.bfloat16)                 # bf16 activations end-to-end
    N, H, W, Cin = x.shape
    Cout = weight.shape[0]

    if groups > 1 and groups == Cin and Cout == Cin:
        w_dw = jnp.transpose(weight.reshape(Cout, k * k), (1, 0))   # (k*k, C)
        return _depthwise_bn_swish(x, w_dw, scale, bias, k, stride, out_dtype)

    if groups == 1:
        w_full = weight
    else:
        # TODO(synk): very many small groups would be better served by a group
        #             grid axis; EfficientNet only uses groups=1 / depthwise,
        #             so a block-diagonal weight (one fused matmul launch, no
        #             per-group launches/concat/lane padding) is used here.
        cin_g, cout_g = Cin // groups, Cout // groups
        w_full = jnp.einsum(
            "gh,goiyx->gohiyx", jnp.eye(groups, dtype=weight.dtype),
            weight.reshape(groups, cout_g, cin_g, k, k)
        ).reshape(Cout, Cin, k, k)

    # (Cout,Cin,kh,kw) -> (kh,kw,Cin,Cout) -> (k*k*Cin, Cout); matches im2col order
    w2d = jnp.transpose(w_full, (2, 3, 1, 0)).reshape(k * k * Cin, Cout)
    return _conv_via_matmul(x, w2d, scale, bias, k, stride, out_dtype)


@functools.partial(jax.jit, static_argnames=("kernel_size", "stride", "groups",
                                             "eps", "out_dtype"))
def conv_bn_act(x_nchw, weight, gamma, beta, running_mean, running_var, *,
                kernel_size, stride, groups, eps=1e-3, out_dtype=jnp.bfloat16):
    """NCHW wrapper matching the PyTorch module (transpose once per boundary)."""
    x = jnp.transpose(x_nchw, (0, 2, 3, 1))
    y = conv_bn_act_nhwc(x, weight, gamma, beta, running_mean, running_var,
                         kernel_size=kernel_size, stride=stride, groups=groups,
                         eps=eps, out_dtype=out_dtype)
    return jnp.transpose(y, (0, 3, 1, 2))


# ---------------------------------------------------------------------------
# Pure-JAX reference (f32) and a deterministic test harness
# ---------------------------------------------------------------------------
def _ref_conv_bn_act(x, w, gamma, beta, mean, var, k, stride, groups, eps):
    pad = (k - 1) // 2
    y = jax.lax.conv_general_dilated(
        x, w, window_strides=(stride, stride),
        padding=[(pad, pad), (pad, pad)],
        dimension_numbers=("NCHW", "OIHW", "NCHW"),
        feature_group_count=groups)
    scale = gamma / jnp.sqrt(var + eps)
    bias = beta - mean * scale
    y = y * scale[None, :, None, None] + bias[None, :, None, None]
    return y * jax.nn.sigmoid(y)


def _make_params(key, cin, cout, k, groups):
    kw_, kg, kb, km, kv = jax.random.split(key, 5)
    fan_out = cout * k * k // groups
    w = jax.random.normal(kw_, (cout, cin // groups, k, k), jnp.float32) \
        * math.sqrt(2.0 / fan_out)
    gamma = jax.random.uniform(kg, (cout,), jnp.float32, 0.5, 1.5)
    beta = jax.random.normal(kb, (cout,), jnp.float32) * 0.1
    mean = jax.random.normal(km, (cout,), jnp.float32) * 0.1
    var = jax.random.uniform(kv, (cout,), jnp.float32, 0.5, 1.5)
    return w, gamma, beta, mean, var


def _check(y_f32, ref, name):
    assert y_f32.shape == ref.shape, (name, y_f32.shape, ref.shape)
    assert bool(jnp.all(jnp.isfinite(y_f32))), name
    err = float(jnp.max(jnp.abs(y_f32 - ref)))
    assert bool(jnp.allclose(y_f32, ref, rtol=0.05, atol=0.1)), (name, err)


if __name__ == "__main__":
    key = jax.random.PRNGKey(0)
    kx, k1, k2, k3 = jax.random.split(key, 4)
    EPS = 1e-3
    x = jax.random.normal(kx, (2, 4, 16, 16), jnp.float32)       # NCHW

    p1 = _make_params(k1, 4, 32, 3, 1)     # ConvBnAct(4 -> 32, k=3, s=1, g=1)
    p2 = _make_params(k2, 32, 32, 3, 32)   # ConvBnAct(32 -> 32, k=3, s=2, g=32)
    p3 = _make_params(k3, 4, 8, 3, 2)      # ConvBnAct(4 -> 8,  k=3, s=1, g=2)

    # ---- NHWC chain: transpose once at the model boundary only -------------
    x_nhwc = jnp.transpose(x, (0, 2, 3, 1))

    y1 = conv_bn_act_nhwc(x_nhwc, *p1, kernel_size=3, stride=1, groups=1, eps=EPS)
    y1 = jax.block_until_ready(y1)
    assert y1.shape == (2, 16, 16, 32) and str(y1.dtype) == "bfloat16"
    ref1 = _ref_conv_bn_act(x, *p1, 3, 1, 1, EPS)
    _check(jnp.transpose(y1, (0, 3, 1, 2)).astype(jnp.float32), ref1, "stage1")

    y2 = conv_bn_act_nhwc(y1, *p2, kernel_size=3, stride=2, groups=32, eps=EPS)
    y2 = jax.block_until_ready(y2)
    assert y2.shape == (2, 8, 8, 32)
    ref2 = _ref_conv_bn_act(jnp.transpose(y1, (0, 3, 1, 2)).astype(jnp.float32),
                            *p2, 3, 2, 32, EPS)
    _check(jnp.transpose(y2, (0, 3, 1, 2)).astype(jnp.float32), ref2, "stage2")

    # ---- NCHW module-equivalent wrapper (generic grouped conv path) --------
    y3 = conv_bn_act(x, *p3, kernel_size=3, stride=1, groups=2, eps=EPS)
    y3 = jax.block_until_ready(y3)
    assert y3.shape == (2, 8, 16, 16)
    ref3 = _ref_conv_bn_act(x, *p3, 3, 1, 2, EPS)
    _check(y3.astype(jnp.float32), ref3, "stage3")

    print("KERNEL_OK")
</pallas_src>

<mosaic_0001>
module attributes {stable_mosaic.version = 11 : i64} {
  func.func @_matmul_bn_act_kernel_noacc(%arg0: i32, %arg1: i32, %arg2: memref<256x48xbf16, #tpu.memory_space<vmem>>, %arg3: memref<48x128xbf16, #tpu.memory_space<vmem>>, %arg4: memref<1x128xf32, #tpu.memory_space<vmem>>, %arg5: memref<1x128xf32, #tpu.memory_space<vmem>>, %arg6: memref<256x128xbf16, #tpu.memory_space<vmem>>) attributes {dimension_semantics = [#tpu.dimension_semantics<parallel>, #tpu.dimension_semantics<parallel>], iteration_bounds = array<i64: 2, 1>, scalar_prefetch = 0 : i64, scratch_operands = 0 : i64, tpu.core_type = #tpu.core_type<tc>, window_params = [{transform_indices = @transform_0, window_bounds = array<i64: 256, 48>}, {transform_indices = @transform_1, window_bounds = array<i64: 48, 128>}, {transform_indices = @transform_2, window_bounds = array<i64: 1, 128>}, {transform_indices = @transform_3, window_bounds = array<i64: 1, 128>}, {transform_indices = @transform_4, window_bounds = array<i64: 256, 128>}]} {
    %c0 = arith.constant 0 : index
    %c0_0 = arith.constant 0 : index
    %0 = vector.load %arg2[%c0, %c0_0] : memref<256x48xbf16, #tpu.memory_space<vmem>>, vector<256x48xbf16>
    %c0_1 = arith.constant 0 : index
    %c0_2 = arith.constant 0 : index
    %1 = vector.load %arg3[%c0_1, %c0_2] : memref<48x128xbf16, #tpu.memory_space<vmem>>, vector<48x128xbf16>
    %cst = arith.constant dense<0.000000e+00> : vector<256x128xf32>
    %2 = tpu.matmul %0, %1, %cst {dimension_numbers = #tpu.dot_dimension_numbers<[1], [0], [0], [1], [0, 0, 1, 1], [], []>} : vector<256x48xbf16>, vector<48x128xbf16>, vector<256x128xf32> -> vector<256x128xf32>
    %c0_3 = arith.constant 0 : index
    %c0_4 = arith.constant 0 : index
    %3 = vector.load %arg4[%c0_3, %c0_4] : memref<1x128xf32, #tpu.memory_space<vmem>>, vector<1x128xf32>
    %4 = vector.broadcast %3 : vector<1x128xf32> to vector<256x128xf32>
    %5 = arith.mulf %2, %4 : vector<256x128xf32>
    %c0_5 = arith.constant 0 : index
    %c0_6 = arith.constant 0 : index
    %6 = vector.load %arg5[%c0_5, %c0_6] : memref<1x128xf32, #tpu.memory_space<vmem>>, vector<1x128xf32>
    %7 = vector.broadcast %6 : vector<1x128xf32> to vector<256x128xf32>
    %8 = arith.addf %5, %7 : vector<256x128xf32>
    %9 = arith.negf %8 : vector<256x128xf32>
    %10 = math.exp %9 : vector<256x128xf32>
    %cst_7 = arith.constant 1.000000e+00 : f32
    %11 = vector.broadcast %cst_7 : f32 to vector<256x128xf32>
    %12 = arith.addf %11, %10 : vector<256x128xf32>
    %13 = arith.divf %11, %12 : vector<256x128xf32>
    %14 = arith.mulf %8, %13 : vector<256x128xf32>
    %15 = arith.truncf %14 : vector<256x128xf32> to vector<256x128xbf16>
    %c0_8 = arith.constant 0 : index
    %c0_9 = arith.constant 0 : index
    %16 = vector.load %arg6[%c0_8, %c0_9] : memref<256x128xbf16, #tpu.memory_space<vmem>>, vector<256x128xbf16>
    tpu.vector_store %arg6[%c0_8, %c0_9], %15 {strides = array<i32>} : memref<256x128xbf16, #tpu.memory_space<vmem>>, vector<256x128xbf16>,
    return
  }
  func.func @transform_0(%arg0: i32, %arg1: i32) -> (i32, i32) {
    %c0_i32 = arith.constant 0 : i32
    %c0_i32_0 = arith.constant 0 : i32
    return %arg0, %c0_i32 : i32, i32
  }
  func.func @transform_1(%arg0: i32, %arg1: i32) -> (i32, i32) {
    %c0_i32 = arith.constant 0 : i32
    %c0_i32_0 = arith.constant 0 : i32
    return %c0_i32, %arg1 : i32, i32
  }
  func.func @transform_2(%arg0: i32, %arg1: i32) -> (i32, i32) {
    %c0_i32 = arith.constant 0 : i32
    %c0_i32_0 = arith.constant 0 : i32
    return %c0_i32, %arg1 : i32, i32
  }
  func.func @transform_3(%arg0: i32, %arg1: i32) -> (i32, i32) {
    %c0_i32 = arith.constant 0 : i32
    %c0_i32_0 = arith.constant 0 : i32
    return %c0_i32, %arg1 : i32, i32
  }
  func.func @transform_4(%arg0: i32, %arg1: i32) -> (i32, i32) {
    %c0_i32 = arith.constant 0 : i32
    return %arg0, %arg1 : i32, i32
  }
}

</mosaic_0001>

<bundles_post_ra>
// kernel: conv_bn_act_nhwc.1
= control target key start
LH: loop header
LB: loop body
LE: loop exit
PB: predicated region body
PF: predicated region fallthrough
CT: control target
= control target key end

     0   :  { %9 = vsyncpa [#allocation3], 0  ;;  %s3056_s0 = inlined_call_operand.vmem [shape: bf16[512,48], index: 0, kind: input, shape index: {}]   ;;  %s3057_s1 = inlined_call_operand.vmem [shape: bf16[48,128], index: 1, kind: input, shape index: {}]   ;;  %s3058_s2 = inlined_call_operand.vmem [shape: f32[1,128], index: 2, kind: input, shape index: {}]   ;;  %s3059_s3 = inlined_call_operand.vmem [shape: f32[1,128], index: 3, kind: input, shape index: {}]   ;;  %s3060_s4 = inlined_call_operand.hbm [shape: bf16[512,128], index: 4, kind: output, shape index: {}]  }
   0x1   :  { %11 = vsyncpa [#allocation3 + $0x1], 0  ;;  %s1997_s15 = smov 0   ;;  %s1999_s16 = smov 0  }
   0x2   :  { %s2001_s17 = smov 0   ;;  %s2003_s18 = smov 0  }
   0x3   :  { %s2005_s19 = smov 0   ;;  %s2007_s20 = smov 0  }
   0x4 LB: > { %s1437_s21 = sadd.s32 4294967295, %s1968_s20   ;;  %s1438_s22 = sadd.s32 4294967294, %s1968_s20   ;;  %s1968_s20 = sphi %s2007_s20, %s17_s20   ;;  %s1964_s19 = sphi %s2005_s19, %s3147_s19   ;;  %s1960_s18 = sphi %s2003_s18, %s3146_s18   ;;  %s1956_s17 = sphi %s2001_s17, %s3145_s17   ;;  %s1952_s16 = sphi %s1999_s16, %s3144_s16   ;;  %s1948_s15 = sphi %s1997_s15, %s3143_s15  }
   0x5   : > { %s29_s23 = sadd.s32 1, %s1964_s19  ;;  %s142_s24 = sadd.s32 1, %s1956_s17 }
   0x6   : > { %p31_p0 = scmp.ge.s32.totalorder %s29_s23, 2  ;;  %p152_p1 = scmp.ne.s32.totalorder %s1956_s17, %s1952_s16 }
   0x7   : > { %p153_p2 = scmp.eq.s32.totalorder %s1437_s21, 1  ;;  %p158_p3 = scmp.ne.s32.totalorder %s1952_s16, %s1948_s15 }
   0x8   : > { %s3149_s23 = smov (%p31_p0, %s29_s23), 0  ;;  %p159_p5 = scmp.eq.s32.totalorder %s1438_s22, 1 }
   0x9   : > { %p2037_p4 = por %p153_p2, %p152_p1  ;;  %s137_s26 = ssub.s32 %s1964_s19, %s3149_s23 }
   0xa   : > { %p1444_p6 = scmp.ge.s32.totalorder %s1968_s20, 1  ;;  %p140_p7 = scmp.eq.s32.totalorder %s137_s26, 0 }
   0xb   : > { %p2044_p8 = por %p159_p5, %p158_p3  ;;  %p205_p9 = scmp.lt.s32.totalorder %s1968_s20, 3 }
   0xc   : > { %s2050_s28 = scalar_select %p140_p7, %s1956_s17, %s142_s24  }
   0xd   : > { %p206_p10 = pnand %p1444_p6, %p205_p9 }
   0xe   : > { %s1446_s5 = sshll.u32 (!%p206_p10), %s1960_s18, 5  ;;  %s238_s26 = sand.u32 (!%p206_p10), 1, %s1952_s16  }
   0xf   : > { %209 = sbr.rel (%p206_p10) target bundleno = 332 (0x14c), region = 36  ;;  %p242_p11 = scmp.lt.s32.totalorder (!%p206_p10), %s1446_s5, 63 }
  0x10   : > { %s2303_s29 = sshll.u32 (!%p206_p10), %s238_s26, 7  ;;  %s1596_s9 = sshll.u32 (!%p206_p10), %s1960_s18, 7 }
  0x11   : > { %s2345_s30 = scalar_lea.vmem (!%p206_p10), [#allocation2], %s2303_s29  ;;  %s1322_s11 = scalar_lea.hbm (!%p206_p10), %s3060_s4, %s1596_s9 }
  0x12   : > { %s1323_s12 = sshll.u32 (!%p206_p10), %s2345_s30, 4  ;;  %s1310_s14 = scalar_lea.sflag (!%p206_p10), [#allocation3], %s238_s26  ;;  %s1324_s12 = int_to_ptr.vmem [resolvable:$true] %s1323_s12 }
  0x14   : > { %v1595_v0 = vld [vmem:[%s3057_s1 + $0x10] sm:$0xff]  ;;  %v1594_v1 = vld [vmem:[%s3057_s1 + $0x8] sm:$0xff]  ;;  %s3151_s5 = smov (!%p242_p11, %s1446_s5), 63  ;;  %v1593_v2 = vld [vmem:[%s3057_s1] sm:$0xff]  ;;  %vm395_vm0 = vcmask 392192  }
  0x15   : > { %449 = vmatpush.bf16.msra.mxu0 %v1595_v0  ;;  %1692 = vmatpush.bf16.msra.mxu1 %v1595_v0  ;;  %s1447_s8 = sshll.u32 %s3151_s5, 2  ;;  %v2102_v19 = vld [vmem:[%s3058_s2] ss:$0 sm:$0xff]  ;;  %s1910_s5 = scalar_lea.hbm %s3060_s4, 256 }
  0x16   : > { %1693 = vmatpush.bf16.msra.mxu2 %v1595_v0  ;;  %1694 = vmatpush.bf16.msra.mxu3 %v1595_v0  ;;  %s2065_s13 = scalar_lea.vmem %s3056_s0, %s1447_s8  ;;  %v2107_v20 = vld [vmem:[%s3059_s3] ss:$0 sm:$0xff] }
  0x17   : > { %v1577_v3 = vld [vmem:[%s2065_s13] sm:$0xff]  ;;  %v1578_v7 = vld [vmem:[%s2065_s13 + $0x8] sm:$0xff]  ;;  %v1579_v11 = vld [vmem:[%s2065_s13 + $0x10] sm:$0xff] }
  0x18   : > { %v1581_v4 = vld [vmem:[%s2065_s13 + $0x20] sm:$0xff]  ;;  %v1582_v8 = vld [vmem:[%s2065_s13 + $0x28] sm:$0xff]  ;;  %v1583_v12 = vld [vmem:[%s2065_s13 + $0x30] sm:$0xff] }
  0x19   : > { %450 = vmatpush.bf16.msra.mxu0 %v1594_v1  ;;  %1695 = vmatpush.bf16.msra.mxu1 %v1594_v1  ;;  %v1585_v5 = vld [vmem:[%s2065_s13 + $0x40] sm:$0xff]  ;;  %v1586_v9 = vld [vmem:[%s2065_s13 + $0x48] sm:$0xff]  ;;  %v1587_v13 = vld [vmem:[%s2065_s13 + $0x50] sm:$0xff] }
  0x1a   : > { %1696 = vmatpush.bf16.msra.mxu2 %v1594_v1  ;;  %1697 = vmatpush.bf16.msra.mxu3 %v1594_v1  ;;  %v1589_v6 = vld [vmem:[%s2065_s13 + $0x60] sm:$0xff]  ;;  %v1590_v10 = vld [vmem:[%s2065_s13 + $0x68] sm:$0xff]  ;;  %v1591_v14 = vld [vmem:[%s2065_s13 + $0x70] sm:$0xff] }
  0x1b   : > { %v1580_v15 = vld [vmem:[%s2065_s13 + $0x18] sm:$0xff] }
  0x1c   : > { %v1584_v16 = vld [vmem:[%s2065_s13 + $0x38] sm:$0xff] }
  0x1d   : > { %451 = vmatpush.bf16.msra.mxu0 %v1593_v2  ;;  %1698 = vmatpush.bf16.msra.mxu1 %v1593_v2  ;;  %v1588_v17 = vld [vmem:[%s2065_s13 + $0x58] sm:$0xff] }
  0x1e   : > { %1699 = vmatpush.bf16.msra.mxu2 %v1593_v2  ;;  %1700 = vmatpush.bf16.msra.mxu3 %v1593_v2  ;;  %v1592_v18 = vld [vmem:[%s2065_s13 + $0x78] sm:$0xff]  ;;  %s1325_s13 = sshll.u32 %s1322_s11, 4  ;;  %s1326_s13 = int_to_ptr.hbm [resolvable:$true] %s1325_s13 }
  0x1f   : > { %s1904_s21 = sshra.s32 %s1326_s13, 4  ;;  %s1905_s21 = int_to_ptr.hbm [resolvable:$true] %s1904_s21 }
  0x20   : > { %1524 = vmatmul.msk.bf16.vlgmr.msra.gmra.mxu0 %vm395_vm0, %v1577_v3  ;;  %1528 = vmatmul.msk.bf16.vlgmr.msra.gmra.mxu1 %vm395_vm0, %v1581_v4  ;;  %s1906_s22 = scalar_lea.hbm %s1905_s21, 128  ;;  %p1911_p1 = scmp.lt.s32.totalorder %s1905_s21, %s3060_s4 }
  0x21   : > { %1532 = vmatmul.msk.bf16.vlgmr.msra.gmra.mxu2 %vm395_vm0, %v1585_v5  ;;  %1536 = vmatmul.msk.bf16.vlgmr.msra.gmra.mxu3 %vm395_vm0, %v1589_v6  ;;  %p1907_p12 = scmp.ne.s32.totalorder %s1905_s21, %s1906_s22  ;;  %p1912_p2 = scmp.lt.s32.totalorder %s1910_s5, %s1906_s22 }
  0x23   : > { %p1908_p13 = pnand %p1907_p12, %p2037_p4  ;;  %p1913_p3 = por %p1912_p2, %p1911_p1 }
  0x25   : > { %p1909_p0 = pneg %p1908_p13 }
  0x27   : > { %p1914_p5 = pnand %p1913_p3, %p1909_p0 }
  0x30   : > { %1525 = vmatmul.msk.bf16.gmra.mxu0 %vm395_vm0, %v1578_v7  ;;  %1529 = vmatmul.msk.bf16.gmra.mxu1 %vm395_vm0, %v1582_v8 }
  0x31   : > { %1533 = vmatmul.msk.bf16.gmra.mxu2 %vm395_vm0, %v1586_v9  ;;  %1537 = vmatmul.msk.bf16.gmra.mxu3 %vm395_vm0, %v1590_v10 }
  0x40   : > { %1526 = vmatmul.msk.bf16.gmra.mxu0 %vm395_vm0, %v1579_v11  ;;  %1530 = vmatmul.msk.bf16.gmra.mxu1 %vm395_vm0, %v1583_v12 }
  0x41   : > { %1534 = vmatmul.msk.bf16.gmra.mxu2 %vm395_vm0, %v1587_v13  ;;  %1538 = vmatmul.msk.bf16.gmra.mxu3 %vm395_vm0, %v1591_v14 }
  0x50   : > { %1527 = vmatmul.msk.bf16.gmra.mxu0 %vm395_vm0, %v1580_v15  ;;  %1531 = vmatmul.msk.bf16.gmra.mxu1 %vm395_vm0, %v1584_v16 }
  0x51   : > { %1535 = vmatmul.msk.bf16.gmra.mxu2 %vm395_vm0, %v1588_v17  ;;  %1539 = vmatmul.msk.bf16.gmra.mxu3 %vm395_vm0, %v1592_v18 }
  0x9d   : > { %v453_v21 = vpop.f32.mrf.mxu0  ;;  %v473_v22 = vpop.f32.mrf.mxu1 }
  0x9e   : > { %v537_v23 = vmul.f32 %v2102_v19, %v453_v21  ;;  %v545_v24 = vmul.f32 %v2102_v19, %v473_v22 }
  0xa0   : > { %v2112_v25 = vadd.f32 %v2107_v20, %v537_v23  ;;  %v2115_v26 = vadd.f32 %v2107_v20, %v545_v24 }
  0xa2   : > { %v1540_v27 = vmul.f32 -1.442695, %v2112_v25  ;;  %v1548_v28 = vmul.f32 -1.442695, %v2115_v26 }
  0xa4   : > { %1760 = vpow2.f32 %v1540_v27  ;;  %v493_v29 = vpop.f32.mrf.mxu2  ;;  %v513_v30 = vpop.f32.mrf.mxu3 }
  0xa5   : > { %1762 = vpow2.f32 %v1548_v28  ;;  %v553_v31 = vmul.f32 %v2102_v19, %v493_v29  ;;  %v561_v32 = vmul.f32 %v2102_v19, %v513_v30  ;;  %v455_v33 = vpop.f32.mrf.mxu0  ;;  %v475_v34 = vpop.f32.mrf.mxu1 }
  0xa6   : > { %v538_v35 = vmul.f32 %v2102_v19, %v455_v33  ;;  %v546_v36 = vmul.f32 %v2102_v19, %v475_v34 }
  0xa7   : > { %v2124_v37 = vadd.f32 %v2107_v20, %v553_v31  ;;  %v2127_v38 = vadd.f32 %v2107_v20, %v561_v32 }
  0xa8   : > { %v2130_v39 = vadd.f32 %v2107_v20, %v538_v35  ;;  %v2133_v40 = vadd.f32 %v2107_v20, %v546_v36 }
  0xa9   : > { %v1556_v41 = vmul.f32 -1.442695, %v2124_v37  ;;  %v1564_v42 = vmul.f32 -1.442695, %v2127_v38 }
  0xaa   : > { %v1761_v43 = vpop.eup %1760  ;;  %v1541_v46 = vmul.f32 -1.442695, %v2130_v39  ;;  %v1549_v48 = vmul.f32 -1.442695, %v2133_v40 }
  0xab   : > { %v1763_v44 = vpop.eup %1762  ;;  %v2137_v45 = vadd.f32 1.0, %v1761_v43  ;;  %1764 = vpow2.f32 %v1556_v41 }
  0xac   : > { %v2140_v47 = vadd.f32 1.0, %v1763_v44  ;;  %1766 = vpow2.f32 %v1564_v42  ;;  %v495_v49 = vpop.f32.mrf.mxu2  ;;  %v515_v53 = vpop.f32.mrf.mxu3 }
  0xad   : > { %1768 = vrcp.f32 %v2137_v45  ;;  %v554_v50 = vmul.f32 %v2102_v19, %v495_v49  ;;  %v744_v57 = vand.u32 2147483648, %v2137_v45  ;;  %v742_v61 = vand.u32 2147483647, %v2137_v45  ;;  %v458_v63 = vpop.f32.mrf.mxu0  ;;  %v478_v0 = vpop.f32.mrf.mxu1 }
  0xae   : > { %1770 = vrcp.f32 %v2140_v47  ;;  %v562_v62 = vmul.f32 %v2102_v19, %v515_v53  ;;  %vm738_vm1 = vweird.f32 %v2137_v45  ;;  %v864_v3 = vand.u32 2147483648, %v2140_v47 }
  0xaf   : > { %1772 = vpow2.f32 %v1541_v46  ;;  %v2147_v52 = vadd.f32 %v2107_v20, %v554_v50  ;;  %vm858_vm2 = vweird.f32 %v2140_v47  ;;  %v862_v7 = vand.u32 2147483647, %v2140_v47 }
  0xb0   : > { %1774 = vpow2.f32 %v1549_v48  ;;  %v745_v8 = vor.u32 1.1754944e-38, %v744_v57  ;;  %v539_v10 = vmul.f32 %v2102_v19, %v458_v63  ;;  %v547_v11 = vmul.f32 %v2102_v19, %v478_v0 }
  0xb1   : > { %v1765_v51 = vpop.eup %1764  ;;  %v1557_v4 = vmul.f32 -1.442695, %v2147_v52  ;;  %vm2174_vm3 = vcmp.eq.f32.partialorder %v742_v61, 8.507059e+37  ;;  %v2183_v16 = vadd.f32 %v2107_v20, %v562_v62  ;;  %v865_v18 = vor.u32 1.1754944e-38, %v864_v3 }
  0xb2   : > { %v1767_v54 = vpop.eup %1766  ;;  %v2149_v55 = vadd.f32 1.0, %v1765_v51  ;;  %vm2190_vm5 = vcmp.eq.f32.partialorder %v862_v7, 8.507059e+37  ;;  %v2201_v30 = vadd.f32 %v2107_v20, %v539_v10  ;;  %v2204_v31 = vadd.f32 %v2107_v20, %v547_v11 }
  0xb3   : > { %v2151_v56 = vpop.eup %1768  ;;  %v2154_v58 = vadd.f32 1.0, %v1767_v54  ;;  %v1565_v34 = vmul.f32 -1.442695, %v2183_v16 }
  0xb4   : > { %v2156_v59 = vpop.eup %1770  ;;  %v734_v60 = vmul.f32 %v2151_v56, %v2137_v45  ;;  %1776 = vrcp.f32 %v2149_v55  ;;  %vm739_vm4 = vweird.f32 %v2151_v56  ;;  %v984_v24 = vand.u32 2147483648, %v2149_v55 }
  0xb5   : > { %v1773_v1 = vpop.eup %1772  ;;  %v854_v2 = vmul.f32 %v2156_v59, %v2140_v47  ;;  %1778 = vrcp.f32 %v2154_v58  ;;  %v1104_v27 = vand.u32 2147483648, %v2154_v58  ;;  %v982_v29 = vand.u32 2147483647, %v2149_v55  ;;  %vm2216_vm7 = vmor %vm738_vm1, %vm739_vm4  ;;  %v460_v35 = vpop.f32.mrf.mxu0 }
  0xb6   : > { %v1775_v5 = vpop.eup %1774  ;;  %v735_v6 = vsub.f32 1.0, %v734_v60  ;;  %v2178_v14 = vadd.f32 1.0, %v1773_v1  ;;  %1780 = vpow2.f32 %v1557_v4  ;;  %vm859_vm6 = vweird.f32 %v2156_v59 }
  0xb7   : > { %v855_v9 = vsub.f32 1.0, %v854_v2  ;;  %v2180_v15 = vadd.f32 1.0, %v1775_v5  ;;  %vm978_vm8 = vweird.f32 %v2149_v55  ;;  %v985_v44 = vor.u32 1.1754944e-38, %v984_v24  ;;  %vm2232_vm9 = vmor %vm858_vm2, %vm859_vm6 }
  0xb8   : > { %v736_v12 = vmul.f32 %v2151_v56, %v735_v6  ;;  %1782 = vrcp.f32 %v2178_v14  ;;  %v757_v42 = vand.u32 2147483647, %v2178_v14  ;;  %v1102_v46 = vand.u32 2147483647, %v2154_v58  ;;  %v498_v6 = vpop.f32.mrf.mxu2 }
  0xb9   : > { %v856_v17 = vmul.f32 %v2156_v59, %v855_v9  ;;  %1784 = vrcp.f32 %v2180_v15  ;;  %v2228_v45 = vor.u32 1.1754944e-38, %v1104_v27  ;;  %vm2238_vm11 = vcmp.eq.f32.partialorder %v982_v29, 8.507059e+37 }
  0xba   : > { %v2187_v21 = vpop.eup %1776  ;;  %v737_v22 = vadd.f32 %v2151_v56, %v736_v12  ;;  %vm753_vm12 = vweird.f32 %v2178_v14  ;;  %v759_v53 = vand.u32 2147483648, %v2178_v14  ;;  %1786 = vpow2.f32 %v1565_v34 }
  0xbb   : > { %v974_v28 = vmul.f32 %v2187_v21, %v2149_v55  ;;  %v2206_v32 = vpop.eup %1778  ;;  %v857_v33 = vadd.f32 %v2156_v59, %v856_v17  ;;  %vm979_vm10 = vweird.f32 %v2187_v21  ;;  %vm2253_vm13 = vcmp.eq.f32.partialorder %v757_v42, 8.507059e+37 }
  0xbc   : > { %v1094_v41 = vmul.f32 %v2206_v32, %v2154_v58  ;;  %v741_v43 = vsel %vm2216_vm7, %v2151_v56, %v737_v22  ;;  %v1781_v48 = vpop.eup %1780  ;;  %vm1098_vm14 = vweird.f32 %v2154_v58  ;;  %v879_v1 = vand.u32 2147483648, %v2180_v15  ;;  %vm2271_vm0 = vmor %vm978_vm8, %vm979_vm10 }
  0xbd   : > { %v975_v36 = vsub.f32 1.0, %v974_v28  ;;  %v861_v47 = vsel %vm2232_vm9, %v2156_v59, %v857_v33  ;;  %v2247_v57 = vadd.f32 1.0, %v1781_v48  ;;  %v746_v60 = vsel %vm2174_vm3, %v745_v8, %v741_v43 }
  0xbe   : > { %v1783_v54 = vpop.eup %1782  ;;  %v1095_v56 = vsub.f32 1.0, %v1094_v41  ;;  %v877_v59 = vand.u32 2147483647, %v2180_v15  ;;  %v1542_v2 = vmul.f32 -1.442695, %v2201_v30  ;;  %v866_v3 = vsel %vm2190_vm5, %v865_v18, %v861_v47 }
  0xbf   : > { %v976_v50 = vmul.f32 %v2187_v21, %v975_v36  ;;  %v749_v62 = vmul.f32 %v1783_v54, %v2178_v14  ;;  %v1785_v0 = vpop.eup %1784  ;;  %1788 = vrcp.f32 %v2247_v57  ;;  %vm873_vm15 = vweird.f32 %v2180_v15 }
  0xc0   : > { %v869_v5 = vmul.f32 %v1785_v0, %v2180_v15  ;;  %v1213_v7 = vmul.f32 %v746_v60, %v2112_v25  ;;  %v1096_v9 = vmul.f32 %v2206_v32, %v1095_v56  ;;  %vm1099_vm1 = vweird.f32 %v2206_v32  ;;  %v1787_v13 = vpop.eup %1786 }
  0xc1   : > { %v977_v61 = vadd.f32 %v2187_v21, %v976_v50  ;;  %v750_v4 = vsub.f32 1.0, %v749_v62  ;;  %v760_v10 = vor.u32 1.1754944e-38, %v759_v53  ;;  %vm754_vm2 = vweird.f32 %v1783_v54  ;;  %vm2319_vm9 = vmor %vm1098_vm14, %vm1099_vm1  ;;  %v500_v62 = vpop.f32.mrf.mxu2 }
  0xc2   : > { %v870_v25 = vsub.f32 1.0, %v869_v5  ;;  %v1221_v17 = vmul.f32 %v866_v3, %v2115_v26  ;;  %vm2281_vm3 = vcmp.eq.f32.partialorder %v1102_v46, 8.507059e+37  ;;  %vm2286_vm4 = vcmp.eq.f32.partialorder %v877_v59, 8.507059e+37  ;;  %v518_v26 = vpop.f32.mrf.mxu3  ;;  %vm755_vm7 = vmor %vm753_vm12, %vm754_vm2 }
  0xc3   : > { %v981_v11 = vsel %vm2271_vm0, %v2187_v21, %v977_v61  ;;  %v751_v12 = vmul.f32 %v1783_v54, %v750_v4  ;;  %v880_v22 = vor.u32 1.1754944e-38, %v879_v1  ;;  %1790 = vpow2.f32 %v1542_v2  ;;  %v480_v61 = vpop.f32.mrf.mxu1 }
  0xc4   : > { %v871_v21 = vmul.f32 %v1785_v0, %v870_v25  ;;  %vm874_vm5 = vweird.f32 %v1785_v0  ;;  %vm993_vm6 = vweird.f32 %v2247_v57  ;;  %v2291_v24 = vadd.f32 1.0, %v1787_v13 }
  0xc5   : > { %v752_v23 = vadd.f32 %v1783_v54, %v751_v12  ;;  %v1789_v27 = vpop.eup %1788  ;;  %v986_v28 = vsel %vm2238_vm11, %v985_v44, %v981_v11  ;;  %v1097_v29 = vadd.f32 %v2206_v32, %v1096_v9  ;;  %v1550_v33 = vmul.f32 -1.442695, %v2204_v31  ;;  %vm875_vm8 = vmor %vm873_vm15, %vm874_vm5 }
  0xc6   : > { %v555_v34 = vmul.f32 %v2102_v19, %v498_v6  ;;  %v872_v41 = vadd.f32 %v1785_v0, %v871_v21  ;;  %v989_v42 = vmul.f32 %v1789_v27, %v2247_v57  ;;  %v997_v43 = vand.u32 2147483647, %v2247_v57 }
  0xc7   : > { %v756_v36 = vsel %vm755_vm7, %v1783_v54, %v752_v23  ;;  %v999_v14 = vand.u32 2147483648, %v2247_v57  ;;  %1792 = vrcp.f32 %v2291_v24  ;;  %v563_v46 = vmul.f32 %v2102_v19, %v518_v26 }
  0xc8   : > { %v761_v44 = vsel %vm2253_vm13, %v760_v10, %v756_v36  ;;  %v876_v50 = vsel %vm875_vm8, %v1785_v0, %v872_v41  ;;  %v990_v51 = vsub.f32 1.0, %v989_v42  ;;  %v540_v15 = vmul.f32 %v2102_v19, %v460_v35 }
  0xc9   : > { %v1214_v49 = vmul.f32 %v761_v44, %v2130_v39  ;;  %v1791_v53 = vpop.eup %1790  ;;  %v1101_v54 = vsel %vm2319_vm9, %v2206_v32, %v1097_v29  ;;  %v881_v47 = vsel %vm2286_vm4, %v880_v22, %v876_v50  ;;  %1794 = vpow2.f32 %v1550_v33 }
  0xca   : > { %v2331_v58 = vadd.f32 %v2107_v20, %v555_v34  ;;  %v1222_v39 = vmul.f32 %v881_v47, %v2133_v40  ;;  %v991_v60 = vmul.f32 %v1789_v27, %v990_v51  ;;  %vm994_vm10 = vweird.f32 %v1789_v27  ;;  %v520_v12 = vpop.f32.mrf.mxu3 }
  0xcb   : > { %v1600_v56 = vpack.c.bf16 %v1214_v49, %v1213_v7  ;;  %v1229_v63 = vmul.f32 %v986_v28, %v2124_v37  ;;  %v2335_v0 = vadd.f32 1.0, %v1791_v53  ;;  %v2339_v59 = vadd.f32 %v2107_v20, %v563_v46  ;;  %vm995_vm11 = vmor %vm993_vm6, %vm994_vm10 }
  0xcc   : > { %v1558_v32 = vmul.f32 -1.442695, %v2331_v58  ;;  %v1106_v1 = vsel %vm2281_vm3, %v2228_v45, %v1101_v54  ;;  %v1620_v40 = vpack.c.bf16 %v1222_v39, %v1221_v17  ;;  %v992_v2 = vadd.f32 %v1789_v27, %v991_v60 }
  0xcd   : > { %1601 = vst [vmem:[%s2345_s30] sm:$0xff] %v1600_v56   ;;  %v2349_v37 = vadd.f32 %v2107_v20, %v540_v15  ;;  %v1793_v3 = vpop.eup %1792  ;;  %v1000_v4 = vor.u32 1.1754944e-38, %v999_v14  ;;  %1796 = vrcp.f32 %v2335_v0  ;;  %v548_v5 = vmul.f32 %v2102_v19, %v480_v61 }
  0xce   : > { %v556_v45 = vmul.f32 %v2102_v19, %v500_v62  ;;  %1680 = vst [vmem:[%s2345_s30 + $0x20] sm:$0xff] %v1620_v40   ;;  %v996_v6 = vsel %vm995_vm11, %v1789_v27, %v992_v2  ;;  %vm998_vm12 = vcmp.eq.f32.partialorder %v997_v43, 8.507059e+37  ;;  %v1109_v7 = vmul.f32 %v1793_v3, %v2291_v24 }
  0xcf   : > { %1798 = vpow2.f32 %v1558_v32  ;;  %v1795_v8 = vpop.eup %1794  ;;  %v1001_v9 = vsel %vm998_vm12, %v1000_v4, %v996_v6  ;;  %v1117_v10 = vand.u32 2147483647, %v2291_v24  ;;  %v1119_v57 = vand.u32 2147483648, %v2291_v24 }
  0xd0   : > { %v1566_v11 = vmul.f32 -1.442695, %v2339_v59  ;;  %v1230_v25 = vmul.f32 %v1001_v9, %v2147_v52  ;;  %v1110_v13 = vsub.f32 1.0, %v1109_v7  ;;  %v2362_v17 = vadd.f32 1.0, %v1795_v8 }
  0xd1   : > { %v1543_v55 = vmul.f32 -1.442695, %v2349_v37  ;;  %vm1114_vm13 = vweird.f32 %v1793_v3  ;;  %v2366_v18 = vadd.f32 %v2107_v20, %v548_v5  ;;  %v2369_v22 = vadd.f32 %v2107_v20, %v556_v45 }
  0xd2   : > { %1800 = vpow2.f32 %v1566_v11  ;;  %v1640_v23 = vpack.c.bf16 %v1230_v25, %v1229_v63  ;;  %v1111_v21 = vmul.f32 %v1793_v3, %v1110_v13  ;;  %v564_v52 = vmul.f32 %v2102_v19, %v520_v12 }
  0xd3   : > { %1802 = vrcp.f32 %v2362_v17  ;;  %v2373_v26 = vpop.eup %1796  ;;  %v1551_v27 = vmul.f32 -1.442695, %v2366_v18  ;;  %v1237_v29 = vmul.f32 %v1106_v1, %v2127_v38  ;;  %vm1113_vm14 = vweird.f32 %v2291_v24 }
  0xd4   : > { %1804 = vpow2.f32 %v1543_v55  ;;  %1684 = vst [vmem:[%s2345_s30 + $0x40] sm:$0xff] %v1640_v23   ;;  %v1112_v33 = vadd.f32 %v1793_v3, %v1111_v21  ;;  %v764_v34 = vmul.f32 %v2373_v26, %v2335_v0  ;;  %vm1115_vm15 = vmor %vm1113_vm14, %vm1114_vm13  ;;  %v1120_v35 = vor.u32 1.1754944e-38, %v1119_v57 }
  0xd5   : > { %v1799_v28 = vpop.eup %1798  ;;  %1806 = vpow2.f32 %v1551_v27  ;;  %v1559_v41 = vmul.f32 -1.442695, %v2369_v22  ;;  %vm1118_vm0 = vcmp.eq.f32.partialorder %v1117_v10, 8.507059e+37  ;;  %v2386_v38 = vadd.f32 %v2107_v20, %v564_v52 }
  0xd6   : > { %v2382_v36 = vadd.f32 1.0, %v1799_v28  ;;  %v1116_v42 = vsel %vm1115_vm15, %v1793_v3, %v1112_v33  ;;  %v765_v43 = vsub.f32 1.0, %v764_v34  ;;  %vm768_vm1 = vweird.f32 %v2335_v0 }
  0xd7   : > { %v1121_v14 = vsel %vm1118_vm0, %v1120_v35, %v1116_v42  ;;  %v772_v24 = vand.u32 2147483647, %v2335_v0  ;;  %v774_v50 = vand.u32 2147483648, %v2335_v0  ;;  %v892_v54 = vand.u32 2147483647, %v2362_v17 }
  0xd8   : > { %v1801_v44 = vpop.eup %1800  ;;  %1808 = vrcp.f32 %v2382_v36  ;;  %v1238_v48 = vmul.f32 %v1121_v14, %v2183_v16  ;;  %v766_v49 = vmul.f32 %v2373_v26, %v765_v43  ;;  %v1567_v47 = vmul.f32 -1.442695, %v2386_v38 }
  0xd9   : > { %v2391_v46 = vpop.eup %1802  ;;  %v2396_v51 = vadd.f32 1.0, %v1801_v44  ;;  %1810 = vpow2.f32 %v1559_v41  ;;  %vm769_vm2 = vweird.f32 %v2373_v26  ;;  %vm2405_vm3 = vcmp.eq.f32.partialorder %v772_v24, 8.507059e+37 }
  0xda   : > { %v1805_v15 = vpop.eup %1804  ;;  %v884_v53 = vmul.f32 %v2391_v46, %v2362_v17  ;;  %v1660_v56 = vpack.c.bf16 %v1238_v48, %v1237_v29  ;;  %v767_v39 = vadd.f32 %v2373_v26, %v766_v49  ;;  %v894_v62 = vand.u32 2147483648, %v2362_v17  ;;  %vm2419_vm4 = vmor %vm768_vm1, %vm769_vm2  ;;  %v463_v48 = vpop.f32.mrf.mxu0 }
  0xdb   : > { %1812 = vrcp.f32 %v2396_v51  ;;  %v1807_v16 = vpop.eup %1806  ;;  %v1012_v63 = vand.u32 2147483647, %v2382_v36  ;;  %v1014_v32 = vand.u32 2147483648, %v2382_v36  ;;  %v2413_v1 = vadd.f32 1.0, %v1805_v15  ;;  %v483_v49 = vpop.f32.mrf.mxu1 }
  0xdc   : > { %v885_v61 = vsub.f32 1.0, %v884_v53  ;;  %1688 = vst [vmem:[%s2345_s30 + $0x60] sm:$0xff] %v1660_v56   ;;  %v2415_v40 = vadd.f32 1.0, %v1807_v16  ;;  %1814 = vpow2.f32 %v1567_v47  ;;  %v775_v4 = vor.u32 1.1754944e-38, %v774_v50 }
  0xdd   : > { %vm888_vm5 = vweird.f32 %v2362_v17  ;;  %vm2425_vm6 = vcmp.eq.f32.partialorder %v892_v54, 8.507059e+37  ;;  %v771_v6 = vsel %vm2419_vm4, %v2373_v26, %v767_v39  ;;  %vm889_vm7 = vweird.f32 %v2391_v46  ;;  %v503_v54 = vpop.f32.mrf.mxu2 }
  0xde   : > { %v1809_v2 = vpop.eup %1808  ;;  %v886_v5 = vmul.f32 %v2391_v46, %v885_v61  ;;  %1816 = vrcp.f32 %v2413_v1  ;;  %v895_v9 = vor.u32 1.1754944e-38, %v894_v62  ;;  %vm1008_vm8 = vweird.f32 %v2382_v36  ;;  %vm2449_vm10 = vmor %vm888_vm5, %vm889_vm7 }
  0xdf   : > { %v1004_v0 = vmul.f32 %v1809_v2, %v2382_v36  ;;  %v1811_v7 = vpop.eup %1810  ;;  %v1134_v10 = vand.u32 2147483648, %v2396_v51  ;;  %vm2440_vm9 = vcmp.eq.f32.partialorder %v1012_v63, 8.507059e+37  ;;  %v1015_v25 = vor.u32 1.1754944e-38, %v1014_v32 }
  0xe0   : > { %v887_v8 = vadd.f32 %v2391_v46, %v886_v5  ;;  %1818 = vrcp.f32 %v2415_v40  ;;  %v776_v13 = vsel %vm2405_vm3, %v775_v4, %v771_v6  ;;  %vm1128_vm11 = vweird.f32 %v2396_v51 }
  0xe1   : > { %v2438_v57 = vpop.eup %1812  ;;  %v1005_v11 = vsub.f32 1.0, %v1004_v0  ;;  %v1132_v21 = vand.u32 2147483647, %v2396_v51  ;;  %v787_v52 = vand.u32 2147483647, %v2413_v1  ;;  %vm1009_vm12 = vweird.f32 %v1809_v2 }
  0xe2   : > { %v1124_v23 = vmul.f32 %v2438_v57, %v2396_v51  ;;  %v1815_v26 = vpop.eup %1814  ;;  %v891_v27 = vsel %vm2449_vm10, %v2391_v46, %v887_v8  ;;  %v789_v17 = vand.u32 2147483648, %v2413_v1  ;;  %v2462_v33 = vor.u32 1.1754944e-38, %v1134_v10  ;;  %vm1010_vm15 = vmor %vm1008_vm8, %vm1009_vm12 }
  0xe3   : > { %v1006_v28 = vmul.f32 %v1809_v2, %v1005_v11  ;;  %v907_v34 = vand.u32 2147483647, %v2415_v40  ;;  %v2465_v35 = vadd.f32 1.0, %v1811_v7  ;;  %v2468_v42 = vmul.f32 %v776_v13, %v2201_v30 }
  0xe4   : > { %v1125_v29 = vsub.f32 1.0, %v1124_v23  ;;  %v1817_v41 = vpop.eup %1816  ;;  %vm1129_vm13 = vweird.f32 %v2438_v57  ;;  %vm783_vm14 = vweird.f32 %v2413_v1  ;;  %v896_v44 = vsel %vm2425_vm6, %v895_v9, %v891_v27  ;;  %v523_v23 = vpop.f32.mrf.mxu3 }
  0xe5   : > { %v1007_v43 = vadd.f32 %v1809_v2, %v1006_v28  ;;  %v779_v24 = vmul.f32 %v1817_v41, %v2413_v1  ;;  %vm2478_vm0 = vcmp.eq.f32.partialorder %v787_v52, 8.507059e+37  ;;  %vm903_vm1 = vweird.f32 %v2415_v40  ;;  %vm2510_vm4 = vmor %vm1128_vm11, %vm1129_vm13 }
  0xe6   : > { %v1126_v14 = vmul.f32 %v2438_v57, %v1125_v29  ;;  %v2483_v30 = vadd.f32 1.0, %v1815_v26  ;;  %v1819_v50 = vpop.eup %1818  ;;  %v790_v53 = vor.u32 1.1754944e-38, %v789_v17  ;;  %v909_v36 = vand.u32 2147483648, %v2415_v40 }
  0xe7   : > { %v1011_v15 = vsel %vm1010_vm15, %v1809_v2, %v1007_v43  ;;  %1820 = vrcp.f32 %v2465_v35  ;;  %v780_v39 = vsub.f32 1.0, %v779_v24  ;;  %v899_v16 = vmul.f32 %v1819_v50, %v2415_v40 }
  0xe8   : > { %v1016_v47 = vsel %vm2440_vm9, %v1015_v25, %v1011_v15  ;;  %v2490_v56 = vadd.f32 %v2438_v57, %v1126_v14  ;;  %vm2493_vm2 = vcmp.eq.f32.partialorder %v907_v34, 8.507059e+37  ;;  %vm784_vm3 = vweird.f32 %v1817_v41  ;;  %v505_v14 = vpop.f32.mrf.mxu2 }
  0xe9   : > { %v1029_v61 = vand.u32 2147483648, %v2465_v35  ;;  %v541_v62 = vmul.f32 %v2102_v19, %v463_v48  ;;  %v549_v63 = vmul.f32 %v2102_v19, %v483_v49  ;;  %v781_v32 = vmul.f32 %v1817_v41, %v780_v39  ;;  %vm785_vm8 = vmor %vm783_vm14, %vm784_vm3 }
  0xea   : > { %v900_v2 = vsub.f32 1.0, %v899_v16  ;;  %v1027_v3 = vand.u32 2147483647, %v2465_v35  ;;  %1822 = vrcp.f32 %v2483_v30  ;;  %v1223_v4 = vmul.f32 %v896_v44, %v2204_v31  ;;  %v485_v44 = vpop.f32.mrf.mxu1 }
  0xeb   : > { %v2504_v5 = vmul.f32 %v1016_v47, %v2331_v58  ;;  %vm904_vm5 = vweird.f32 %v1819_v50  ;;  %v910_v6 = vor.u32 1.1754944e-38, %v909_v36  ;;  %v1131_v0 = vsel %vm2510_vm4, %v2438_v57, %v2490_v56 }
  0xec   : > { %v782_v7 = vadd.f32 %v1817_v41, %v781_v32  ;;  %v901_v31 = vmul.f32 %v1819_v50, %v900_v2  ;;  %vm1023_vm6 = vweird.f32 %v2465_v35  ;;  %v1030_v58 = vor.u32 1.1754944e-38, %v1029_v61  ;;  %vm905_vm10 = vmor %vm903_vm1, %vm904_vm5  ;;  %v525_v45 = vpop.f32.mrf.mxu3 }
  0xed   : > { %v1821_v8 = vpop.eup %1820  ;;  %vm2519_vm7 = vcmp.eq.f32.partialorder %v1132_v21, 8.507059e+37  ;;  %v1147_v51 = vand.u32 2147483647, %v2483_v30  ;;  %v2528_v10 = vadd.f32 %v2107_v20, %v541_v62  ;;  %v2531_v57 = vadd.f32 %v2107_v20, %v549_v63 }
  0xee   : > { %v557_v11 = vmul.f32 %v2102_v19, %v503_v54  ;;  %v786_v12 = vsel %vm785_vm8, %v1817_v41, %v782_v7  ;;  %v902_v25 = vadd.f32 %v1819_v50, %v901_v31  ;;  %v1019_v13 = vmul.f32 %v1821_v8, %v2465_v35  ;;  %v465_v41 = vpop.f32.mrf.mxu0 }
  0xef   : > { %vm2535_vm9 = vcmp.eq.f32.partialorder %v1027_v3, 8.507059e+37  ;;  %v1149_v1 = vand.u32 2147483648, %v2483_v30  ;;  %v791_v21 = vsel %vm2478_vm0, %v790_v53, %v786_v12  ;;  %vm1024_vm11 = vweird.f32 %v1821_v8 }
  0xf0   : > { %v1544_v52 = vmul.f32 -1.442695, %v2528_v10  ;;  %v1552_v26 = vmul.f32 -1.442695, %v2531_v57  ;;  %v1823_v27 = vpop.eup %1822  ;;  %v1216_v28 = vmul.f32 %v791_v21, %v2349_v37  ;;  %v906_v17 = vsel %vm905_vm10, %v1819_v50, %v902_v25  ;;  %vm1025_vm13 = vmor %vm1023_vm6, %vm1024_vm11 }
  0xf1   : > { %v1020_v29 = vsub.f32 1.0, %v1019_v13  ;;  %v2549_v34 = vadd.f32 %v2107_v20, %v557_v11  ;;  %v911_v43 = vsel %vm2493_vm2, %v910_v6, %v906_v17  ;;  %v1139_v40 = vmul.f32 %v1823_v27, %v2483_v30 }
  0xf2   : > { %vm1144_vm12 = vweird.f32 %v1823_v27  ;;  %1824 = vpow2.f32 %v1544_v52  ;;  %v1605_v24 = vpack.c.bf16 %v1216_v28, %v2468_v42  ;;  %v1224_v37 = vmul.f32 %v911_v43, %v2366_v18 }
  0xf3   : > { %v1021_v46 = vmul.f32 %v1821_v8, %v1020_v29  ;;  %1826 = vpow2.f32 %v1552_v26  ;;  %v1140_v48 = vsub.f32 1.0, %v1139_v40  ;;  %v1560_v49 = vmul.f32 -1.442695, %v2549_v34 }
  0xf4   : > { %v565_v50 = vmul.f32 %v2102_v19, %v523_v23  ;;  %v542_v15 = vmul.f32 %v2102_v19, %v465_v41  ;;  %1677 = vst [vmem:[%s2345_s30 + $0x8] sm:$0xff] %v1605_v24   ;;  %v1625_v53 = vpack.c.bf16 %v1224_v37, %v1223_v4  ;;  %v550_v54 = vmul.f32 %v2102_v19, %v485_v44 }
  0xf5   : > { %v1022_v36 = vadd.f32 %v1821_v8, %v1021_v46  ;;  %v558_v47 = vmul.f32 %v2102_v19, %v505_v14  ;;  %v1141_v18 = vmul.f32 %v1823_v27, %v1140_v48  ;;  %1828 = vpow2.f32 %v1560_v49  ;;  %v488_v14 = vpop.f32.mrf.mxu1 }
  0xf6   : > { %v2566_v42 = vadd.f32 %v2107_v20, %v565_v50  ;;  %v2569_v56 = vadd.f32 %v2107_v20, %v542_v15  ;;  %v1136_v39 = vsel %vm2519_vm7, %v2462_v33, %v1131_v0  ;;  %1681 = vst [vmem:[%s2345_s30 + $0x28] sm:$0xff] %v1625_v53   ;;  %vm1143_vm14 = vweird.f32 %v2483_v30  ;;  %v468_v17 = vpop.f32.mrf.mxu0 }
  0xf7   : > { %v1026_v16 = vsel %vm1025_vm13, %v1821_v8, %v1022_v36  ;;  %vm2576_vm15 = vcmp.eq.f32.partialorder %v1147_v51, 8.507059e+37  ;;  %v1142_v62 = vadd.f32 %v1823_v27, %v1141_v18  ;;  %v2584_v32 = vadd.f32 %v2107_v20, %v550_v54  ;;  %vm1145_vm0 = vmor %vm1143_vm14, %vm1144_vm12 }
  0xf8   : > { %v1825_v35 = vpop.eup %1824  ;;  %v1031_v61 = vsel %vm2535_vm9, %v1030_v58, %v1026_v16  ;;  %v1568_v63 = vmul.f32 -1.442695, %v2566_v42  ;;  %v1150_v30 = vor.u32 1.1754944e-38, %v1149_v1  ;;  %v2591_v4 = vadd.f32 %v2107_v20, %v558_v47 }
  0xf9   : > { %v1827_v2 = vpop.eup %1826  ;;  %v1232_v33 = vmul.f32 %v1031_v61, %v2369_v22  ;;  %v2588_v3 = vadd.f32 1.0, %v1825_v35  ;;  %v1146_v6 = vsel %vm1145_vm0, %v1823_v27, %v1142_v62  ;;  %v1545_v7 = vmul.f32 -1.442695, %v2569_v56  ;;  %v2776_v61 = vld [vmem:[%s3058_s2] ss:$0 sm:$0xff] }
  0xfa   : > { %v2593_v0 = vadd.f32 1.0, %v1827_v2  ;;  %1830 = vpow2.f32 %v1568_v63  ;;  %v1239_v31 = vmul.f32 %v1136_v39, %v2339_v59  ;;  %v1151_v58 = vsel %vm2576_vm15, %v1150_v30, %v1146_v6 }
  0xfb   : > { %v1645_v22 = vpack.c.bf16 %v1232_v33, %v2504_v5  ;;  %1832 = vrcp.f32 %v2588_v3  ;;  %v1829_v8 = vpop.eup %1828  ;;  %v1240_v9 = vmul.f32 %v1151_v58, %v2386_v38  ;;  %v1553_v51 = vmul.f32 -1.442695, %v2584_v32 }
  0xfc   : > { %1834 = vrcp.f32 %v2593_v0  ;;  %v566_v11 = vmul.f32 %v2102_v19, %v525_v45  ;;  %v2606_v12 = vadd.f32 1.0, %v1829_v8  ;;  %v1561_v5 = vmul.f32 -1.442695, %v2591_v4 }
  0xfd   : > { %1685 = vst [vmem:[%s2345_s30 + $0x48] sm:$0xff] %v1645_v22   ;;  %v1665_v59 = vpack.c.bf16 %v1240_v9, %v1239_v31  ;;  %1836 = vpow2.f32 %v1545_v7  ;;  %v804_v13 = vand.u32 2147483648, %v2588_v3  ;;  %v924_v1 = vand.u32 2147483648, %v2593_v0 }
  0xfe   : > { %1838 = vrcp.f32 %v2606_v12  ;;  %v2613_v38 = vadd.f32 %v2107_v20, %v566_v11  ;;  %vm798_vm1 = vweird.f32 %v2588_v3  ;;  %v802_v26 = vand.u32 2147483647, %v2588_v3 }
  0xff   : > { %1689 = vst [vmem:[%s2345_s30 + $0x68] sm:$0xff] %v1665_v59   ;;  %1840 = vpow2.f32 %v1553_v51  ;;  %vm918_vm2 = vweird.f32 %v2593_v0  ;;  %v922_v28 = vand.u32 2147483647, %v2593_v0  ;;  %v805_v43 = vor.u32 1.1754944e-38, %v804_v13 }
 0x100   : > { %v1831_v25 = vpop.eup %1830  ;;  %1842 = vpow2.f32 %v1561_v5  ;;  %v1042_v40 = vand.u32 2147483647, %v2606_v12  ;;  %v1569_v44 = vmul.f32 -1.442695, %v2613_v38  ;;  %v925_v46 = vor.u32 1.1754944e-38, %v924_v1 }
 0x101   : > { %v2615_v55 = vpop.eup %1832  ;;  %v2618_v23 = vadd.f32 1.0, %v1831_v25  ;;  %vm1038_vm3 = vweird.f32 %v2606_v12  ;;  %vm2637_vm4 = vcmp.eq.f32.partialorder %v802_v26, 8.507059e+37  ;;  %v1044_v36 = vand.u32 2147483648, %v2606_v12 }
 0x102   : > { %v2620_v21 = vpop.eup %1834  ;;  %v794_v52 = vmul.f32 %v2615_v55, %v2588_v3  ;;  %v543_v54 = vmul.f32 %v2102_v19, %v468_v17  ;;  %vm799_vm5 = vweird.f32 %v2615_v55  ;;  %vm2646_vm6 = vcmp.eq.f32.partialorder %v922_v28, 8.507059e+37  ;;  %v2789_v3 = vld [vmem:[%s3059_s3] ss:$0 sm:$0xff] }
 0x103   : > { %v914_v27 = vmul.f32 %v2620_v21, %v2593_v0  ;;  %1844 = vrcp.f32 %v2618_v23  ;;  %v1837_v29 = vpop.eup %1836  ;;  %v551_v39 = vmul.f32 %v2102_v19, %v488_v14  ;;  %vm2653_vm7 = vcmp.eq.f32.partialorder %v1042_v40, 8.507059e+37  ;;  %vm2673_vm10 = vmor %vm798_vm1, %vm799_vm5 }
 0x104   : > { %v795_v41 = vsub.f32 1.0, %v794_v52  ;;  %v1839_v24 = vpop.eup %1838  ;;  %v2634_v48 = vadd.f32 1.0, %v1837_v29  ;;  %vm919_vm8 = vweird.f32 %v2620_v21  ;;  %v1164_v2 = vand.u32 2147483648, %v2618_v23 }
 0x105   : > { %v915_v37 = vsub.f32 1.0, %v914_v27  ;;  %v1841_v49 = vpop.eup %1840  ;;  %v1034_v53 = vmul.f32 %v1839_v24, %v2606_v12  ;;  %vm1039_vm9 = vweird.f32 %v1839_v24  ;;  %v2667_v45 = vadd.f32 %v2107_v20, %v543_v54  ;;  %vm2688_vm11 = vmor %vm918_vm2, %vm919_vm8 }
 0x106   : > { %v796_v50 = vmul.f32 %v2615_v55, %v795_v41  ;;  %1846 = vrcp.f32 %v2634_v48  ;;  %v1843_v16 = vpop.eup %1842  ;;  %v2662_v33 = vadd.f32 1.0, %v1841_v49  ;;  %v1045_v7 = vor.u32 1.1754944e-38, %v1044_v36  ;;  %vm2699_vm12 = vmor %vm1038_vm3, %vm1039_vm9  ;;  %v508_v36 = vpop.f32.mrf.mxu2 }
 0x107   : > { %v916_v47 = vmul.f32 %v2620_v21, %v915_v37  ;;  %v1035_v35 = vsub.f32 1.0, %v1034_v53  ;;  %1848 = vpow2.f32 %v1569_v44  ;;  %v1162_v31 = vand.u32 2147483647, %v2618_v23 }
 0x108   : > { %v797_v60 = vadd.f32 %v2615_v55, %v796_v50  ;;  %v2678_v22 = vadd.f32 1.0, %v1843_v16  ;;  %v2681_v58 = vadd.f32 %v2107_v20, %v551_v39  ;;  %v817_v11 = vand.u32 2147483647, %v2634_v48 }
 0x109   : > { %v2657_v62 = vpop.eup %1844  ;;  %v917_v63 = vadd.f32 %v2620_v21, %v916_v47  ;;  %v1036_v19 = vmul.f32 %v1839_v24, %v1035_v35  ;;  %vm1158_vm13 = vweird.f32 %v2618_v23  ;;  %v2704_v0 = vor.u32 1.1754944e-38, %v1164_v2 }
 0x10a   : > { %v1154_v30 = vmul.f32 %v2657_v62, %v2618_v23  ;;  %v801_v8 = vsel %vm2673_vm10, %v2615_v55, %v797_v60  ;;  %v819_v25 = vand.u32 2147483648, %v2634_v48  ;;  %1850 = vrcp.f32 %v2662_v33 }
 0x10b   : > { %v1037_v9 = vadd.f32 %v1839_v24, %v1036_v19  ;;  %v921_v20 = vsel %vm2688_vm11, %v2620_v21, %v917_v63  ;;  %vm813_vm14 = vweird.f32 %v2634_v48  ;;  %v1546_v12 = vmul.f32 -1.442695, %v2667_v45 }
 0x10c   : > { %v1155_v51 = vsub.f32 1.0, %v1154_v30  ;;  %v1847_v59 = vpop.eup %1846  ;;  %v806_v21 = vsel %vm2637_vm4, %v805_v43, %v801_v8  ;;  %vm1159_vm15 = vweird.f32 %v2657_v62  ;;  %1852 = vrcp.f32 %v2678_v22 }
 0x10d   : > { %v1849_v13 = vpop.eup %1848  ;;  %v1041_v55 = vsel %vm2699_vm12, %v1839_v24, %v1037_v9  ;;  %v809_v1 = vmul.f32 %v1847_v59, %v2634_v48  ;;  %v926_v26 = vsel %vm2646_vm6, %v925_v46, %v921_v20  ;;  %vm2720_vm0 = vcmp.eq.f32.partialorder %v817_v11, 8.507059e+37  ;;  %vm2757_vm6 = vmor %vm1158_vm13, %vm1159_vm15  ;;  %v470_v20 = vpop.f32.mrf.mxu0 }
 0x10e   : > { %v1156_v52 = vmul.f32 %v2657_v62, %v1155_v51  ;;  %v937_v17 = vand.u32 2147483647, %v2662_v33  ;;  %v1046_v29 = vsel %vm2653_vm7, %v1045_v7, %v1041_v55  ;;  %vm814_vm1 = vweird.f32 %v1847_v59  ;;  %v528_v7 = vpop.f32.mrf.mxu3 }
 0x10f   : > { %v810_v27 = vsub.f32 1.0, %v809_v1  ;;  %v820_v41 = vor.u32 1.1754944e-38, %v819_v25  ;;  %v2727_v43 = vadd.f32 1.0, %v1849_v13  ;;  %v939_v44 = vand.u32 2147483648, %v2662_v33  ;;  %vm815_vm4 = vmor %vm813_vm14, %vm814_vm1 }
 0x110   : > { %1854 = vpow2.f32 %v1546_v12  ;;  %v1554_v14 = vmul.f32 -1.442695, %v2681_v58  ;;  %v1851_v24 = vpop.eup %1850  ;;  %v1217_v37 = vmul.f32 %v806_v21, %v2528_v10  ;;  %v2733_v46 = vmul.f32 %v926_v26, %v2531_v57 }
 0x111   : > { %v811_v40 = vmul.f32 %v1847_v59, %v810_v27  ;;  %v2736_v49 = vadd.f32 %v2657_v62, %v1156_v52  ;;  %1856 = vrcp.f32 %v2727_v43  ;;  %v929_v15 = vmul.f32 %v1851_v24, %v2662_v33 }
 0x112   : > { %vm933_vm2 = vweird.f32 %v2662_v33  ;;  %vm2741_vm3 = vcmp.eq.f32.partialorder %v937_v17, 8.507059e+37  ;;  %v1853_v54 = vpop.eup %1852  ;;  %v2746_v10 = vmul.f32 %v1046_v29, %v2549_v34  ;;  %vm1053_vm5 = vweird.f32 %v2678_v22  ;;  %v490_v17 = vpop.f32.mrf.mxu1 }
 0x113   : > { %v812_v50 = vadd.f32 %v1847_v59, %v811_v40  ;;  %v1057_v57 = vand.u32 2147483647, %v2678_v22  ;;  %1858 = vpow2.f32 %v1554_v14  ;;  %vm2761_vm7 = vcmp.eq.f32.partialorder %v1162_v31, 8.507059e+37 }
 0x114   : > { %v930_v48 = vsub.f32 1.0, %v929_v15  ;;  %v940_v39 = vor.u32 1.1754944e-38, %v939_v44  ;;  %v1049_v16 = vmul.f32 %v1853_v54, %v2678_v22  ;;  %v1161_v60 = vsel %vm2757_vm6, %v2657_v62, %v2736_v49  ;;  %v510_v15 = vpop.f32.mrf.mxu2 }
 0x115   : > { %v816_v18 = vsel %vm815_vm4, %v1847_v59, %v812_v50  ;;  %v1059_v35 = vand.u32 2147483648, %v2678_v22  ;;  %v559_v63 = vmul.f32 %v2776_v61, %v508_v36  ;;  %vm934_vm8 = vweird.f32 %v1851_v24 }
 0x116   : > { %v821_v23 = vsel %vm2720_vm0, %v820_v41, %v816_v18  ;;  %v1855_v2 = vpop.eup %1854  ;;  %v931_v30 = vmul.f32 %v1851_v24, %v930_v48  ;;  %v1050_v6 = vsub.f32 1.0, %v1049_v16  ;;  %vm1054_vm9 = vweird.f32 %v1853_v54  ;;  %vm935_vm11 = vmor %vm933_vm2, %vm934_vm8  ;;  %v530_v36 = vpop.f32.mrf.mxu3 }
 0x117   : > { %v1218_v19 = vmul.f32 %v821_v23, %v2569_v56  ;;  %v1857_v62 = vpop.eup %1856  ;;  %vm2780_vm10 = vcmp.eq.f32.partialorder %v1057_v57, 8.507059e+37  ;;  %v2784_v8 = vadd.f32 1.0, %v1855_v2  ;;  %v2792_v56 = vadd.f32 %v2789_v3, %v559_v63  ;;  %vm1055_vm12 = vmor %vm1053_vm5, %vm1054_vm9 }
 0x118   : > { %v932_v51 = vadd.f32 %v1851_v24, %v931_v30  ;;  %v1051_v11 = vmul.f32 %v1853_v54, %v1050_v6  ;;  %v1169_v59 = vmul.f32 %v1857_v62, %v2727_v43  ;;  %v1060_v25 = vor.u32 1.1754944e-38, %v1059_v35 }
 0x119   : > { %v1610_v9 = vpack.c.bf16 %v1218_v19, %v1217_v37  ;;  %v1859_v5 = vpop.eup %1858  ;;  %v1177_v13 = vand.u32 2147483647, %v2727_v43  ;;  %v1179_v55 = vand.u32 2147483648, %v2727_v43  ;;  %1860 = vrcp.f32 %v2784_v8 }
 0x11a   : > { %v936_v1 = vsel %vm935_vm11, %v1851_v24, %v932_v51  ;;  %v1052_v12 = vadd.f32 %v1853_v54, %v1051_v11  ;;  %v1170_v21 = vsub.f32 1.0, %v1169_v59  ;;  %v567_v52 = vmul.f32 %v2776_v61, %v528_v7 }
 0x11b   : > { %1678 = vst [vmem:[%s2345_s30 + $0x10] sm:$0xff] %v1610_v9   ;;  %v941_v26 = vsel %vm2741_vm3, %v940_v39, %v936_v1  ;;  %v2808_v33 = vadd.f32 1.0, %v1859_v5  ;;  %v1562_v27 = vmul.f32 -1.442695, %v2792_v56  ;;  %v544_v28 = vmul.f32 %v2776_v61, %v470_v20 }
 0x11c   : > { %v1226_v29 = vmul.f32 %v941_v26, %v2584_v32  ;;  %v1056_v41 = vsel %vm1055_vm12, %v1853_v54, %v1052_v12  ;;  %v1171_v40 = vmul.f32 %v1857_v62, %v1170_v21  ;;  %vm1174_vm13 = vweird.f32 %v1857_v62 }
 0x11d   : > { %v1166_v44 = vsel %vm2761_vm7, %v2704_v0, %v1161_v60  ;;  %v1061_v22 = vsel %vm2780_vm10, %v1060_v25, %v1056_v41  ;;  %vm1173_vm14 = vweird.f32 %v2727_v43  ;;  %1862 = vrcp.f32 %v2808_v33 }
 0x11e   : > { %v1630_v14 = vpack.c.bf16 %v1226_v29, %v2733_v46  ;;  %v1234_v24 = vmul.f32 %v1061_v22, %v2591_v4  ;;  %v1172_v32 = vadd.f32 %v1857_v62, %v1171_v40  ;;  %v552_v37 = vmul.f32 %v2776_v61, %v490_v17  ;;  %vm1175_vm15 = vmor %vm1173_vm14, %vm1174_vm13 }
 0x11f   : > { %v2823_v49 = vpop.eup %1860  ;;  %v1180_v50 = vor.u32 1.1754944e-38, %v1179_v55  ;;  %1864 = vpow2.f32 %v1562_v27  ;;  %v2826_v0 = vadd.f32 %v2789_v3, %v567_v52  ;;  %v2829_v43 = vadd.f32 %v2789_v3, %v544_v28 }
 0x120   : > { %1682 = vst [vmem:[%s2345_s30 + $0x30] sm:$0xff] %v1630_v14   ;;  %v1650_v46 = vpack.c.bf16 %v1234_v24, %v2746_v10  ;;  %v1176_v4 = vsel %vm1175_vm15, %v1857_v62, %v1172_v32  ;;  %vm1178_vm0 = vcmp.eq.f32.partialorder %v1177_v13, 8.507059e+37  ;;  %v824_v53 = vmul.f32 %v2823_v49, %v2784_v8 }
 0x121   : > { %v1241_v54 = vmul.f32 %v1166_v44, %v2566_v42  ;;  %v1181_v57 = vsel %vm1178_vm0, %v1180_v50, %v1176_v4  ;;  %v1570_v47 = vmul.f32 -1.442695, %v2826_v0  ;;  %v1547_v34 = vmul.f32 -1.442695, %v2829_v43 }
 0x122   : > { %1686 = vst [vmem:[%s2345_s30 + $0x50] sm:$0xff] %v1650_v46   ;;  %v1242_v18 = vmul.f32 %v1181_v57, %v2613_v38  ;;  %v825_v48 = vsub.f32 1.0, %v824_v53  ;;  %v2841_v10 = vadd.f32 %v2789_v3, %v552_v37  ;;  %v560_v39 = vmul.f32 %v2776_v61, %v510_v15 }
 0x123   : > { %v2844_v16 = vpop.eup %1862  ;;  %1866 = vpow2.f32 %v1570_v47  ;;  %v568_v42 = vmul.f32 %v2776_v61, %v530_v36  ;;  %vm828_vm1 = vweird.f32 %v2784_v8  ;;  %vm829_vm2 = vweird.f32 %v2823_v49 }
 0x124   : > { %v1670_v60 = vpack.c.bf16 %v1242_v18, %v1241_v54  ;;  %v826_v23 = vmul.f32 %v2823_v49, %v825_v48  ;;  %v944_v35 = vmul.f32 %v2844_v16, %v2808_v33  ;;  %1868 = vpow2.f32 %v1547_v34  ;;  %vm2873_vm3 = vmor %vm828_vm1, %vm829_vm2 }
 0x125   : > { %v1865_v63 = vpop.eup %1864  ;;  %v1555_v38 = vmul.f32 -1.442695, %v2841_v10  ;;  %v2852_v2 = vadd.f32 %v2789_v3, %v560_v39  ;;  %v2855_v19 = vadd.f32 %v2789_v3, %v568_v42  ;;  %v834_v9 = vand.u32 2147483648, %v2784_v8 }
 0x126   : > { %1690 = vst [vmem:[%s2345_s30 + $0x70] sm:$0xff] %v1670_v60   ;;  %v945_v30 = vsub.f32 1.0, %v944_v35  ;;  %v2858_v6 = vadd.f32 1.0, %v1865_v63  ;;  %v827_v62 = vadd.f32 %v2823_v49, %v826_v23  ;;  %v832_v51 = vand.u32 2147483647, %v2784_v8 }
 0x127   : > { %1870 = vpow2.f32 %v1555_v38  ;;  %v1563_v61 = vmul.f32 -1.442695, %v2852_v2  ;;  %v1571_v7 = vmul.f32 -1.442695, %v2855_v19  ;;  %vm948_vm4 = vweird.f32 %v2808_v33 }
 0x128   : > { %v946_v31 = vmul.f32 %v2844_v16, %v945_v30  ;;  %1872 = vrcp.f32 %v2858_v6  ;;  %v831_v5 = vsel %vm2873_vm3, %v2823_v49, %v827_v62  ;;  %vm949_vm5 = vweird.f32 %v2844_v16 }
 0x129   : > { %v1867_v3 = vpop.eup %1866  ;;  %1874 = vpow2.f32 %v1563_v61  ;;  %v835_v55 = vor.u32 1.1754944e-38, %v834_v9  ;;  %v952_v8 = vand.u32 2147483647, %v2808_v33  ;;  %v954_v1 = vand.u32 2147483648, %v2808_v33  ;;  %vm2895_vm7 = vmor %vm948_vm4, %vm949_vm5 }
 0x12a   : > { %v2869_v11 = vadd.f32 1.0, %v1867_v3  ;;  %1876 = vpow2.f32 %v1571_v7  ;;  %v1869_v59 = vpop.eup %1868  ;;  %v947_v25 = vadd.f32 %v2844_v16, %v946_v31  ;;  %vm833_vm6 = vcmp.eq.f32.partialorder %v832_v51, 8.507059e+37 }
 0x12b   : > { %v2886_v12 = vadd.f32 1.0, %v1869_v59  ;;  %v1074_v52 = vand.u32 2147483648, %v2858_v6  ;;  %v836_v28 = vsel %vm833_vm6, %v835_v55, %v831_v5  ;;  %vm953_vm8 = vcmp.eq.f32.partialorder %v952_v8, 8.507059e+37 }
 0x12c   : > { %1878 = vrcp.f32 %v2869_v11  ;;  %v951_v40 = vsel %vm2895_vm7, %v2844_v16, %v947_v25  ;;  %v955_v44 = vor.u32 1.1754944e-38, %v954_v1  ;;  %v1072_v33 = vand.u32 2147483647, %v2858_v6 }
 0x12d   : > { %v1871_v13 = vpop.eup %1870  ;;  %1880 = vrcp.f32 %v2886_v12  ;;  %v2910_v24 = vmul.f32 %v836_v28, %v2667_v45  ;;  %vm1068_vm9 = vweird.f32 %v2858_v6  ;;  %v2913_v32 = vor.u32 1.1754944e-38, %v1074_v52 }
 0x12e   : > { %v2888_v21 = vpop.eup %1872  ;;  %v2891_v26 = vadd.f32 1.0, %v1871_v13  ;;  %v956_v50 = vsel %vm953_vm8, %v955_v44, %v951_v40  ;;  %vm1188_vm10 = vweird.f32 %v2869_v11  ;;  %v1194_v46 = vand.u32 2147483648, %v2869_v11 }
 0x12f   : > { %v1875_v27 = vpop.eup %1874  ;;  %v1064_v29 = vmul.f32 %v2888_v21, %v2858_v6  ;;  %v1192_v4 = vand.u32 2147483647, %v2869_v11  ;;  %v847_v45 = vand.u32 2147483647, %v2886_v12  ;;  %v849_v53 = vand.u32 2147483648, %v2886_v12 }
 0x130   : > { %v1877_v41 = vpop.eup %1876  ;;  %1882 = vrcp.f32 %v2891_v26  ;;  %v2915_v37 = vadd.f32 1.0, %v1875_v27  ;;  %v967_v47 = vand.u32 2147483647, %v2891_v26  ;;  %v2931_v18 = vmul.f32 %v956_v50, %v2681_v58 }
 0x131   : > { %v1065_v22 = vsub.f32 1.0, %v1064_v29  ;;  %v2917_v49 = vadd.f32 1.0, %v1877_v41  ;;  %vm1069_vm11 = vweird.f32 %v2888_v21  ;;  %v969_v39 = vand.u32 2147483648, %v2891_v26 }
 0x132   : > { %v2907_v14 = vpop.eup %1878  ;;  %1884 = vrcp.f32 %v2915_v37  ;;  %v1195_v42 = vor.u32 1.1754944e-38, %v1194_v46  ;;  %vm843_vm12 = vweird.f32 %v2886_v12  ;;  %vm2939_vm13 = vcmp.eq.f32.partialorder %v847_v45, 8.507059e+37  ;;  %vm2963_vm4 = vmor %vm1068_vm9, %vm1069_vm11 }
 0x133   : > { %v1184_v15 = vmul.f32 %v2907_v14, %v2869_v11  ;;  %v1881_v36 = vpop.eup %1880  ;;  %v1066_v54 = vmul.f32 %v2888_v21, %v1065_v22  ;;  %1886 = vrcp.f32 %v2917_v49  ;;  %v850_v58 = vor.u32 1.1754944e-38, %v849_v53 }
 0x134   : > { %v839_v48 = vmul.f32 %v1881_v36, %v2886_v12  ;;  %vm963_vm14 = vweird.f32 %v2891_v26  ;;  %vm2945_vm15 = vcmp.eq.f32.partialorder %v1072_v33, 8.507059e+37  ;;  %vm1189_vm0 = vweird.f32 %v2907_v14 }
 0x135   : > { %v1185_v57 = vsub.f32 1.0, %v1184_v15  ;;  %v1067_v63 = vadd.f32 %v2888_v21, %v1066_v54  ;;  %vm2950_vm1 = vcmp.eq.f32.partialorder %v967_v47, 8.507059e+37  ;;  %vm2955_vm2 = vcmp.eq.f32.partialorder %v1192_v4, 8.507059e+37  ;;  %vm2973_vm7 = vmor %vm1188_vm10, %vm1189_vm0 }
 0x136   : > { %v1883_v34 = vpop.eup %1882  ;;  %v840_v23 = vsub.f32 1.0, %v839_v48  ;;  %vm844_vm3 = vweird.f32 %v1881_v36  ;;  %v970_v9 = vor.u32 1.1754944e-38, %v969_v39  ;;  %vm1083_vm6 = vweird.f32 %v2915_v37 }
 0x137   : > { %v1186_v16 = vmul.f32 %v2907_v14, %v1185_v57  ;;  %v959_v60 = vmul.f32 %v1883_v34, %v2891_v26  ;;  %vm964_vm5 = vweird.f32 %v1883_v34  ;;  %v1087_v6 = vand.u32 2147483647, %v2915_v37  ;;  %vm845_vm8 = vmor %vm843_vm12, %vm844_vm3 }
 0x138   : > { %v1885_v7 = vpop.eup %1884  ;;  %v841_v3 = vmul.f32 %v1881_v36, %v840_v23  ;;  %v1089_v55 = vand.u32 2147483648, %v2915_v37  ;;  %v1071_v1 = vsel %vm2963_vm4, %v2888_v21, %v1067_v63  ;;  %v1207_v27 = vand.u32 2147483647, %v2917_v49  ;;  %vm965_vm9 = vmor %vm963_vm14, %vm964_vm5 }
 0x139   : > { %v960_v30 = vsub.f32 1.0, %v959_v60  ;;  %v1187_v62 = vadd.f32 %v2907_v14, %v1186_v16  ;;  %v1887_v51 = vpop.eup %1886  ;;  %v1079_v5 = vmul.f32 %v1885_v7, %v2915_v37  ;;  %v1209_v41 = vand.u32 2147483648, %v2917_v49 }
 0x13a   : > { %v842_v13 = vadd.f32 %v1881_v36, %v841_v3  ;;  %v1199_v8 = vmul.f32 %v1887_v51, %v2917_v49  ;;  %vm1084_vm10 = vweird.f32 %v1885_v7  ;;  %vm1204_vm11 = vweird.f32 %v1887_v51 }
 0x13b   : > { %v961_v20 = vmul.f32 %v1883_v34, %v960_v30  ;;  %v1080_v52 = vsub.f32 1.0, %v1079_v5  ;;  %v1191_v28 = vsel %vm2973_vm7, %v2907_v14, %v1187_v62  ;;  %vm1088_vm12 = vcmp.eq.f32.partialorder %v1087_v6, 8.507059e+37 }
 0x13c   : > { %v846_v17 = vsel %vm845_vm8, %v1881_v36, %v842_v13  ;;  %v1200_v29 = vsub.f32 1.0, %v1199_v8  ;;  %vm1203_vm14 = vweird.f32 %v2917_v49  ;;  %v1076_v50 = vsel %vm2945_vm15, %v2913_v32, %v1071_v1 }
 0x13d   : > { %v962_v11 = vadd.f32 %v1883_v34, %v961_v20  ;;  %v851_v12 = vsel %vm2939_vm13, %v850_v58, %v846_v17  ;;  %v1081_v40 = vmul.f32 %v1885_v7, %v1080_v52  ;;  %vm1085_vm13 = vmor %vm1083_vm6, %vm1084_vm10  ;;  %v1210_v32 = vor.u32 1.1754944e-38, %v1209_v41 }
 0x13e   : > { %v1220_v44 = vmul.f32 %v851_v12, %v2829_v43  ;;  %v1201_v33 = vmul.f32 %v1887_v51, %v1200_v29  ;;  %v1090_v43 = vor.u32 1.1754944e-38, %v1089_v55  ;;  %vm1205_vm0 = vmor %vm1203_vm14, %vm1204_vm11  ;;  %vm1208_vm15 = vcmp.eq.f32.partialorder %v1207_v27, 8.507059e+37 }
 0x13f   : > { %v966_v21 = vsel %vm965_vm9, %v1883_v34, %v962_v11  ;;  %v1082_v14 = vadd.f32 %v1885_v7, %v1081_v40  ;;  %v1235_v45 = vmul.f32 %v1076_v50, %v2792_v56 }
 0x140   : > { %v971_v22 = vsel %vm2950_vm1, %v970_v9, %v966_v21  ;;  %v1615_v15 = vpack.c.bf16 %v1220_v44, %v2910_v24  ;;  %v1202_v46 = vadd.f32 %v1887_v51, %v1201_v33 }
 0x141   : > { %v1228_v26 = vmul.f32 %v971_v22, %v2841_v10  ;;  %v1196_v10 = vsel %vm2955_vm2, %v1195_v42, %v1191_v28  ;;  %v1086_v4 = vsel %vm1085_vm13, %v1885_v7, %v1082_v14 }
 0x142   : > { %1679 = vst [vmem:[%s2345_s30 + $0x18] sm:$0xff] %v1615_v15   ;;  %v1091_v24 = vsel %vm1088_vm12, %v1090_v43, %v1086_v4  ;;  %v1206_v37 = vsel %vm1205_vm0, %v1887_v51, %v1202_v46  ;;  %v1243_v54 = vmul.f32 %v1196_v10, %v2826_v0 }
 0x143   : > { %v1635_v49 = vpack.c.bf16 %v1228_v26, %v2931_v18  ;;  %v1236_v53 = vmul.f32 %v1091_v24, %v2852_v2  ;;  %v1211_v36 = vsel %vm1208_vm15, %v1210_v32, %v1206_v37 }
 0x144   : > { %v1244_v57 = vmul.f32 %v1211_v36, %v2855_v19 }
 0x145   : > { %1683 = vst [vmem:[%s2345_s30 + $0x38] sm:$0xff] %v1635_v49   ;;  %v1655_v47 = vpack.c.bf16 %v1236_v53, %v1235_v45 }
 0x146   : > { %v1675_v34 = vpack.c.bf16 %v1244_v57, %v1243_v54 }
 0x147   : > { %1687 = vst [vmem:[%s2345_s30 + $0x58] sm:$0xff] %v1655_v47  }
 0x148   : > { %1691 = vst [vmem:[%s2345_s30 + $0x78] sm:$0xff] %v1675_v34  }
 0x149   : > { %1917 = shalt.err (!%p1914_p5)
}
 0x14a   : > { %s1970_s26 = smov 64   ;;  %s1971_s30 = smov 4  }
 0x14b   : > { %1701 = dma.vmem_to_hbm [thread:$0]  (%p2037_p4), %s1324_s12, 2048, %s1326_s13, %s1310_s14, %s1970_s26, %s1970_s26, %s1971_s30  }
 0x14c PF: > { %p1707_p6 = scmp.ge.s32.totalorder %s1968_s20, 2  ;;  %s1340_s8 = sand.u32 1, %s1948_s15  }
 0x14d   : > { %s1341_s9 = scalar_lea.sflag [#allocation3], %s1340_s8 }
 0x14e   : > { %p1704_p7 = pnand %p1707_p6, %p2044_p8 }
 0x150   : > { %p1705_p9 = pneg %p1704_p7 }
 0x152   : > { %1943 = dma.done.wait (%p1705_p9), %s1341_s9, 2048  }
 0x153   : > { %1945 = vsyncadd (%p1705_p9), %s1341_s9, 4294965248  ;;  %s17_s20 = sadd.s32 1, %s1968_s20   ;;  %s3143_s15 = smov %s1952_s16 }
 0x154   : > { %p14_p10 = scmp.ge.s32.totalorder %s17_s20, 4   ;;  %s3144_s16 = smov %s1956_s17 }
 0x155   : > { %s3145_s17 = smov %s2050_s28  ;;  %s3146_s18 = smov %s1964_s19 }
 0x156   : > { %s3147_s19 = smov %s3149_s23  ;;  %16 = sbr.rel (!%p14_p10) target bundleno = 4 (0x4), region = 80 }
 0x15b   :  { %1347 = vsyncpa [#allocation3], 1 }
 0x15c   :  { %1349 = vsyncpa [#allocation3 + $0x1], 1 }

</bundles_post_ra>
